<compile_context>
chip_gen: v5e
topology: v5e:2x2
jax: 0.10.0
libtpu: 0.0.40
codegen_flags: <defaults>
</compile_context>

<pallas_src>
import functools

import jax
import jax.numpy as jnp
from jax.experimental import pallas as pl
from jax.experimental.pallas import tpu as pltpu

EPS = 1e-5  # nn.LayerNorm default eps


def _conv_len(t, k, s, p):
    return (t + 2 * p - k) // s + 1


def _layernorm(x, g, b):
    mu = jnp.mean(x, axis=-1, keepdims=True)
    var = jnp.mean((x - mu) ** 2, axis=-1, keepdims=True)
    return (x - mu) * jax.lax.rsqrt(var + EPS) * g + b


# ----------------------------------------------------------------------------
# Fully fused CTCBlock kernel (single grid step, batch folded into rows)
# ----------------------------------------------------------------------------
def _ctc_fused_kernel(x_ref, scal_ref, w1_ref, wr_ref, cb_ref, gs_ref, bs_ref,
                      fcw_ref, fcb_ref, o_ref,
                      p1_ref, p2_ref, p3_ref, p4_ref, col_ref,
                      *, B, T0, K, stride, pad, chout):
    f32 = jnp.float32
    t_in = [T0]
    for _ in range(4):
        t_in.append(_conv_len(t_in[-1], K, stride, pad))

    # --------------- stage 1: LN(dim=1) -> Conv1d(1->chout) -> PReLU --------
    # TODO(synk): nn.Dropout(0.5) after stages 1/2/4 treated as identity
    # (inference mode).
    g1 = scal_ref[0]
    b1 = scal_ref[1]
    xn = _layernorm(x_ref[...], g1, b1)                       # (B*T0, 1)
    T1 = t_in[1]
    Tp = T0 + 2 * pad
    for bi in range(B):
        base = bi * Tp
        p1_ref[pl.ds(base, pad), :] = jnp.zeros((pad, 1), f32)
        p1_ref[pl.ds(base + pad + T0, pad), :] = jnp.zeros((pad, 1), f32)
        p1_ref[pl.ds(base + pad, T0), :] = xn[bi * T0:(bi + 1) * T0, :]
    parts = []
    for bi in range(B):
        acc = jnp.zeros((T1, chout), f32)
        for k in range(K):
            xk = p1_ref[pl.ds(bi * Tp + k, T1, stride=stride), :]   # (T1, 1)
            acc = acc + xk * w1_ref[k]                              # VPU broadcast FMA
        parts.append(acc)
    y = jnp.concatenate(parts, axis=0) + cb_ref[0]                  # (B*T1, chout)
    y = jnp.where(y >= 0, y, scal_ref[2] * y)                       # PReLU

    # --------- stages 2..4: LN(chout) -> Conv1d(chout->chout) -> PReLU ------
    pads = [p2_ref, p3_ref, p4_ref]
    for s in range(3):
        Tin, Tout = t_in[s + 1], t_in[s + 2]
        Tp = Tin + 2 * pad
        pref = pads[s]
        xn = _layernorm(y, gs_ref[s], bs_ref[s])                    # (B*Tin, chout)
        for bi in range(B):
            base = bi * Tp
            pref[pl.ds(base, pad), :] = jnp.zeros((pad, chout), f32)
            pref[pl.ds(base + pad + Tin, pad), :] = jnp.zeros((pad, chout), f32)
            pref[pl.ds(base + pad, Tin), :] = xn[bi * Tin:(bi + 1) * Tin, :]
        # Assemble im2col matrix (B*Tout, K*chout) in VMEM, then ONE matmul.
        for bi in range(B):
            for k in range(K):
                col_ref[pl.ds(bi * Tout, Tout), pl.ds(k * chout, chout)] = \
                    pref[pl.ds(bi * Tp + k, Tout, stride=stride), :]
        col = col_ref[pl.ds(0, B * Tout), :]                        # (B*Tout, K*chout)
        yy = jnp.dot(col, wr_ref[s], preferred_element_type=f32) + cb_ref[s + 1]
        y = jnp.where(yy >= 0, yy, scal_ref[3 + s] * yy)            # (B*Tout, chout)

    # --------------- final LayerNorm(chout) -> Linear(chout, outdim) --------
    xn = _layernorm(y, gs_ref[3], bs_ref[3])                        # (B*T4, chout)
    out = jnp.dot(xn, fcw_ref[...], preferred_element_type=f32) + fcb_ref[...]
    o_ref[...] = out.astype(o_ref.dtype)


# ----------------------------------------------------------------------------
# Wrapper: parameter packing (glue) + single pallas_call
# ----------------------------------------------------------------------------
def ctc_block_forward(x, params, cfg):
    K, stride, pad = cfg["kernel_size"], cfg["stride"], cfg["padding"]
    chout, outdim = cfg["chout"], cfg["outdim"]
    B, _, T0 = x.shape
    ts = [T0]
    for _ in range(4):
        ts.append(_conv_len(ts[-1], K, stride, pad))
    T1, T2, T3, T4 = ts[1:]

    # channels-last, batch folded into rows: (B, 1, T) -> (B*T, 1)
    xf = jnp.transpose(x, (0, 2, 1)).astype(jnp.float32).reshape(B * T0, 1)

    st = params["stages"]
    # SMEM scalars: [LN1 gamma, LN1 beta, PReLU alpha 1..4]
    scal = jnp.concatenate([
        st[0]["g"].reshape(-1), st[0]["b"].reshape(-1),
        jnp.stack([s["alpha"].reshape(()) for s in st]),
    ]).astype(jnp.float32)                                           # (6,)
    w1 = st[0]["w"].reshape(K, chout).astype(jnp.float32)            # (K, chout)
    wr = jnp.stack(
        [st[i]["w"].reshape(K * chout, chout) for i in (1, 2, 3)]
    ).astype(jnp.float32)                                            # (3, K*chout, chout)
    cb = jnp.concatenate([s["bias"] for s in st], axis=0).astype(jnp.float32)  # (4, chout)
    gs = jnp.concatenate([st[1]["g"], st[2]["g"], st[3]["g"], params["gf"]],
                         axis=0).astype(jnp.float32)                 # (4, chout)
    bs = jnp.concatenate([st[1]["b"], st[2]["b"], st[3]["b"], params["bf"]],
                         axis=0).astype(jnp.float32)                 # (4, chout)
    fcw = params["fcw"].astype(jnp.float32)                          # (chout, outdim)
    fcb = params["fcb"].astype(jnp.float32)                          # (1, outdim)

    kern = functools.partial(_ctc_fused_kernel, B=B, T0=T0, K=K, stride=stride,
                             pad=pad, chout=chout)

    out_flat = pl.pallas_call(
        kern,
        out_shape=jax.ShapeDtypeStruct((B * T4, outdim), jnp.float32),
        grid_spec=pltpu.PrefetchScalarGridSpec(
            num_scalar_prefetch=0,
            grid=(1,),  # single step: whole working set (~100 KB) fits in VMEM
            in_specs=[
                pl.BlockSpec((B * T0, 1), lambda i: (0, 0)),                # x
                pl.BlockSpec(memory_space=pltpu.MemorySpace.SMEM),          # scalars
                pl.BlockSpec((K, chout), lambda i: (0, 0)),                 # conv1 W
                pl.BlockSpec((3, K * chout, chout), lambda i: (0, 0, 0)),   # conv2-4 W
                pl.BlockSpec((4, chout), lambda i: (0, 0)),                 # conv biases
                pl.BlockSpec((4, chout), lambda i: (0, 0)),                 # LN gammas
                pl.BlockSpec((4, chout), lambda i: (0, 0)),                 # LN betas
                pl.BlockSpec((chout, outdim), lambda i: (0, 0)),            # fc W
                pl.BlockSpec((1, outdim), lambda i: (0, 0)),                # fc b
            ],
            out_specs=pl.BlockSpec((B * T4, outdim), lambda i: (0, 0)),
            scratch_shapes=[
                pltpu.VMEM((B * (T0 + 2 * pad), 1), jnp.float32),      # pad buf 1
                pltpu.VMEM((B * (T1 + 2 * pad), chout), jnp.float32),  # pad buf 2
                pltpu.VMEM((B * (T2 + 2 * pad), chout), jnp.float32),  # pad buf 3
                pltpu.VMEM((B * (T3 + 2 * pad), chout), jnp.float32),  # pad buf 4
                pltpu.VMEM((B * T2, K * chout), jnp.float32),          # im2col buf
            ],
        ),
        compiler_params=pltpu.CompilerParams(dimension_semantics=("arbitrary",)),
    )(xf, scal, w1, wr, cb, gs, bs, fcw, fcb)

    return out_flat.reshape(B, T4, outdim)


# ----------------------------------------------------------------------------
# Pure-JAX reference (independent code path) for correctness checking
# ----------------------------------------------------------------------------
def ctc_block_reference(x, params, cfg):
    K, s, p = cfg["kernel_size"], cfg["stride"], cfg["padding"]
    y = jnp.transpose(x, (0, 2, 1)).astype(jnp.float32)
    for st in params["stages"]:
        mu = y.mean(-1, keepdims=True)
        var = ((y - mu) ** 2).mean(-1, keepdims=True)
        yn = (y - mu) / jnp.sqrt(var + EPS) * st["g"] + st["b"]
        yp = jnp.pad(yn, ((0, 0), (p, p), (0, 0)))
        t_out = (y.shape[1] + 2 * p - K) // s + 1
        cols = jnp.stack(
            [yp[:, k:k + s * (t_out - 1) + 1:s, :] for k in range(K)], axis=2
        )  # (B, T_out, K, C_in)
        yc = jnp.einsum("btkc,kcd->btd", cols, st["w"]) + st["bias"]
        y = jnp.where(yc >= 0, yc, st["alpha"][0, 0] * yc)
    mu = y.mean(-1, keepdims=True)
    var = ((y - mu) ** 2).mean(-1, keepdims=True)
    yn = (y - mu) / jnp.sqrt(var + EPS) * params["gf"] + params["bf"]
    return jnp.einsum("btc,cd->btd", yn, params["fcw"]) + params["fcb"]


# ----------------------------------------------------------------------------
# Deterministic parameter init (synthetic; shapes match the nn.Module __init__)
# ----------------------------------------------------------------------------
def init_params(key, cfg):
    K, chout, outdim = cfg["kernel_size"], cfg["chout"], cfg["outdim"]
    stages = []
    c_in = 1
    for _ in range(4):
        key, kg, kb, kw, kc = jax.random.split(key, 5)
        w_torch = 0.3 * jax.random.normal(kw, (chout, c_in, K), jnp.float32)  # (Cout,Cin,K)
        stages.append(dict(
            g=1.0 + 0.1 * jax.random.normal(kg, (1, c_in), jnp.float32),
            b=0.1 * jax.random.normal(kb, (1, c_in), jnp.float32),
            w=jnp.transpose(w_torch, (2, 1, 0)),                 # -> (K, Cin, Cout)
            bias=0.1 * jax.random.normal(kc, (1, chout), jnp.float32),
            alpha=jnp.full((1, 1), 0.25, jnp.float32),           # nn.PReLU() default
        ))
        c_in = chout
    key, kg, kb, kw, kc = jax.random.split(key, 5)
    fcw_torch = 0.2 * jax.random.normal(kw, (outdim, chout), jnp.float32)     # (out,in)
    params = dict(
        stages=stages,
        gf=1.0 + 0.1 * jax.random.normal(kg, (1, chout), jnp.float32),
        bf=0.1 * jax.random.normal(kb, (1, chout), jnp.float32),
        fcw=jnp.transpose(fcw_torch),                            # (chout, outdim)
        fcb=0.1 * jax.random.normal(kc, (1, outdim), jnp.float32),
    )
    return params


if __name__ == "__main__":
    cfg = dict(kernel_size=4, stride=2, padding=1, chout=8, outdim=16)
    B, T = 2, 64

    key = jax.random.PRNGKey(0)
    key, kx = jax.random.split(key)
    x = jax.random.normal(kx, (B, 1, T), jnp.float32)   # PyTorch layout (B, C=1, T)
    params = init_params(key, cfg)

    out = ctc_block_forward(x, params, cfg)
    out = jax.block_until_ready(out)

    ref = ctc_block_reference(x, params, cfg)
    assert out.shape == (B, 4, cfg["outdim"]), out.shape
    err = float(jnp.max(jnp.abs(out - ref)))
    assert jnp.allclose(out, ref, rtol=1e-4, atol=1e-4), err

    print("KERNEL_OK")
</pallas_src>

<mosaic_0001>
module attributes {stable_mosaic.version = 11 : i64} {
  func.func @_ctc_fused_kernel(%arg0: i32, %arg1: memref<128x1xf32, #tpu.memory_space<vmem>>, %arg2: memref<6xf32, #tpu.memory_space<smem>>, %arg3: memref<4x8xf32, #tpu.memory_space<vmem>>, %arg4: memref<3x32x8xf32, #tpu.memory_space<vmem>>, %arg5: memref<4x8xf32, #tpu.memory_space<vmem>>, %arg6: memref<4x8xf32, #tpu.memory_space<vmem>>, %arg7: memref<4x8xf32, #tpu.memory_space<vmem>>, %arg8: memref<8x16xf32, #tpu.memory_space<vmem>>, %arg9: memref<1x16xf32, #tpu.memory_space<vmem>>, %arg10: memref<8x16xf32, #tpu.memory_space<vmem>>, %arg11: memref<132x1xf32, #tpu.memory_space<vmem>>, %arg12: memref<68x8xf32, #tpu.memory_space<vmem>>, %arg13: memref<36x8xf32, #tpu.memory_space<vmem>>, %arg14: memref<20x8xf32, #tpu.memory_space<vmem>>, %arg15: memref<32x32xf32, #tpu.memory_space<vmem>>) attributes {dimension_semantics = [#tpu.dimension_semantics<arbitrary>], iteration_bounds = array<i64: 1>, scalar_prefetch = 0 : i64, scratch_operands = 5 : i64, tpu.core_type = #tpu.core_type<tc>, window_params = [{pipeline_mode = #tpu.pipeline_mode<synchronous>, transform_indices = @transform_0, window_bounds = array<i64: 128, 1>}, {transform_indices = @transform_1, window_bounds = array<i64: 6>}, {pipeline_mode = #tpu.pipeline_mode<synchronous>, transform_indices = @transform_2, window_bounds = array<i64: 4, 8>}, {pipeline_mode = #tpu.pipeline_mode<synchronous>, transform_indices = @transform_3, window_bounds = array<i64: 3, 32, 8>}, {pipeline_mode = #tpu.pipeline_mode<synchronous>, transform_indices = @transform_4, window_bounds = array<i64: 4, 8>}, {pipeline_mode = #tpu.pipeline_mode<synchronous>, transform_indices = @transform_5, window_bounds = array<i64: 4, 8>}, {pipeline_mode = #tpu.pipeline_mode<synchronous>, transform_indices = @transform_6, window_bounds = array<i64: 4, 8>}, {pipeline_mode = #tpu.pipeline_mode<synchronous>, transform_indices = @transform_7, window_bounds = array<i64: 8, 16>}, {pipeline_mode = #tpu.pipeline_mode<synchronous>, transform_indices = @transform_8, window_bounds = array<i64: 1, 16>}, {pipeline_mode = #tpu.pipeline_mode<synchronous>, transform_indices = @transform_9, window_bounds = array<i64: 8, 16>}]} {
    %c0 = arith.constant 0 : index
    %0 = memref.load %arg2[%c0] : memref<6xf32, #tpu.memory_space<smem>>
    %c1 = arith.constant 1 : index
    %1 = memref.load %arg2[%c1] : memref<6xf32, #tpu.memory_space<smem>>
    %c0_0 = arith.constant 0 : index
    %c0_1 = arith.constant 0 : index
    %2 = vector.load %arg1[%c0_0, %c0_1] : memref<128x1xf32, #tpu.memory_space<vmem>>, vector<128x1xf32>
    %cst = arith.constant dense<0.000000e+00> : vector<128xf32>
    %3 = vector.multi_reduction <add>, %2, %cst [1] : vector<128x1xf32> to vector<128xf32>
    %4 = vector.shape_cast %3 : vector<128xf32> to vector<128x1xf32>
    %cst_2 = arith.constant 1.000000e+00 : f32
    %5 = vector.broadcast %cst_2 : f32 to vector<128x1xf32>
    %6 = arith.divf %4, %5 : vector<128x1xf32>
    %7 = arith.subf %2, %6 : vector<128x1xf32>
    %8 = arith.mulf %7, %7 : vector<128x1xf32>
    %cst_3 = arith.constant dense<0.000000e+00> : vector<128xf32>
    %9 = vector.multi_reduction <add>, %8, %cst_3 [1] : vector<128x1xf32> to vector<128xf32>
    %10 = vector.shape_cast %9 : vector<128xf32> to vector<128x1xf32>
    %cst_4 = arith.constant 1.000000e+00 : f32
    %11 = vector.broadcast %cst_4 : f32 to vector<128x1xf32>
    %12 = arith.divf %10, %11 : vector<128x1xf32>
    %13 = arith.subf %2, %6 : vector<128x1xf32>
    %cst_5 = arith.constant 9.99999974E-6 : f32
    %14 = vector.broadcast %cst_5 : f32 to vector<128x1xf32>
    %15 = arith.addf %12, %14 : vector<128x1xf32>
    %16 = math.rsqrt %15 : vector<128x1xf32>
    %17 = arith.mulf %13, %16 : vector<128x1xf32>
    %18 = vector.broadcast %0 : f32 to vector<128x1xf32>
    %19 = arith.mulf %17, %18 : vector<128x1xf32>
    %20 = vector.broadcast %1 : f32 to vector<128x1xf32>
    %21 = arith.addf %19, %20 : vector<128x1xf32>
    %cst_6 = arith.constant 0.000000e+00 : f32
    %22 = vector.broadcast %cst_6 : f32 to vector<1x1xf32>
    %c0_7 = arith.constant 0 : index
    %c0_8 = arith.constant 0 : index
    %23 = vector.load %arg11[%c0_7, %c0_8] : memref<132x1xf32, #tpu.memory_space<vmem>>, vector<1x1xf32>
    tpu.vector_store %arg11[%c0_7, %c0_8], %22 {strides = array<i32>} : memref<132x1xf32, #tpu.memory_space<vmem>>, vector<1x1xf32>,
    %cst_9 = arith.constant 0.000000e+00 : f32
    %24 = vector.broadcast %cst_9 : f32 to vector<1x1xf32>
    %c65 = arith.constant 65 : index
    %c0_10 = arith.constant 0 : index
    %25 = vector.load %arg11[%c65, %c0_10] : memref<132x1xf32, #tpu.memory_space<vmem>>, vector<1x1xf32>
    tpu.vector_store %arg11[%c65, %c0_10], %24 {strides = array<i32>} : memref<132x1xf32, #tpu.memory_space<vmem>>, vector<1x1xf32>,
    %26 = vector.extract_strided_slice %21 {offsets = [0, 0], sizes = [64, 1], strides = [1, 1]} : vector<128x1xf32> to vector<64x1xf32>
    %c1_11 = arith.constant 1 : index
    %c0_12 = arith.constant 0 : index
    %27 = vector.load %arg11[%c1_11, %c0_12] : memref<132x1xf32, #tpu.memory_space<vmem>>, vector<64x1xf32>
    tpu.vector_store %arg11[%c1_11, %c0_12], %26 {strides = array<i32>} : memref<132x1xf32, #tpu.memory_space<vmem>>, vector<64x1xf32>,
    %cst_13 = arith.constant 0.000000e+00 : f32
    %28 = vector.broadcast %cst_13 : f32 to vector<1x1xf32>
    %c66 = arith.constant 66 : index
    %c0_14 = arith.constant 0 : index
    %29 = vector.load %arg11[%c66, %c0_14] : memref<132x1xf32, #tpu.memory_space<vmem>>, vector<1x1xf32>
    tpu.vector_store %arg11[%c66, %c0_14], %28 {strides = array<i32>} : memref<132x1xf32, #tpu.memory_space<vmem>>, vector<1x1xf32>,
    %cst_15 = arith.constant 0.000000e+00 : f32
    %30 = vector.broadcast %cst_15 : f32 to vector<1x1xf32>
    %c131 = arith.constant 131 : index
    %c0_16 = arith.constant 0 : index
    %31 = vector.load %arg11[%c131, %c0_16] : memref<132x1xf32, #tpu.memory_space<vmem>>, vector<1x1xf32>
    tpu.vector_store %arg11[%c131, %c0_16], %30 {strides = array<i32>} : memref<132x1xf32, #tpu.memory_space<vmem>>, vector<1x1xf32>,
    %32 = vector.extract_strided_slice %21 {offsets = [64, 0], sizes = [64, 1], strides = [1, 1]} : vector<128x1xf32> to vector<64x1xf32>
    %c67 = arith.constant 67 : index
    %c0_17 = arith.constant 0 : index
    %33 = vector.load %arg11[%c67, %c0_17] : memref<132x1xf32, #tpu.memory_space<vmem>>, vector<64x1xf32>
    tpu.vector_store %arg11[%c67, %c0_17], %32 {strides = array<i32>} : memref<132x1xf32, #tpu.memory_space<vmem>>, vector<64x1xf32>,
    %cst_18 = arith.constant 0.000000e+00 : f32
    %34 = vector.broadcast %cst_18 : f32 to vector<32x8xf32>
    %c0_19 = arith.constant 0 : index
    %c0_20 = arith.constant 0 : index
    %35 = tpu.strided_load %arg11[%c0_19, %c0_20] {strides = array<i32: 2, 1>} : memref<132x1xf32, #tpu.memory_space<vmem>>, vector<32x1xf32>
    %c0_21 = arith.constant 0 : index
    %c0_22 = arith.constant 0 : index
    %36 = vector.load %arg3[%c0_21, %c0_22] : memref<4x8xf32, #tpu.memory_space<vmem>>, vector<1x8xf32>
    %37 = vector.shape_cast %36 : vector<1x8xf32> to vector<8xf32>
    %38 = vector.shape_cast %37 : vector<8xf32> to vector<1x8xf32>
    %39 = vector.broadcast %35 : vector<32x1xf32> to vector<32x8xf32>
    %40 = vector.broadcast %38 : vector<1x8xf32> to vector<32x8xf32>
    %41 = arith.mulf %39, %40 : vector<32x8xf32>
    %42 = arith.addf %34, %41 : vector<32x8xf32>
    %c1_23 = arith.constant 1 : index
    %c0_24 = arith.constant 0 : index
    %43 = tpu.strided_load %arg11[%c1_23, %c0_24] {strides = array<i32: 2, 1>} : memref<132x1xf32, #tpu.memory_space<vmem>>, vector<32x1xf32>
    %c1_25 = arith.constant 1 : index
    %c0_26 = arith.constant 0 : index
    %44 = vector.load %arg3[%c1_25, %c0_26] : memref<4x8xf32, #tpu.memory_space<vmem>>, vector<1x8xf32>
    %45 = vector.shape_cast %44 : vector<1x8xf32> to vector<8xf32>
    %46 = vector.shape_cast %45 : vector<8xf32> to vector<1x8xf32>
    %47 = vector.broadcast %43 : vector<32x1xf32> to vector<32x8xf32>
    %48 = vector.broadcast %46 : vector<1x8xf32> to vector<32x8xf32>
    %49 = arith.mulf %47, %48 : vector<32x8xf32>
    %50 = arith.addf %42, %49 : vector<32x8xf32>
    %c2 = arith.constant 2 : index
    %c0_27 = arith.constant 0 : index
    %51 = tpu.strided_load %arg11[%c2, %c0_27] {strides = array<i32: 2, 1>} : memref<132x1xf32, #tpu.memory_space<vmem>>, vector<32x1xf32>
    %c2_28 = arith.constant 2 : index
    %c0_29 = arith.constant 0 : index
    %52 = vector.load %arg3[%c2_28, %c0_29] : memref<4x8xf32, #tpu.memory_space<vmem>>, vector<1x8xf32>
    %53 = vector.shape_cast %52 : vector<1x8xf32> to vector<8xf32>
    %54 = vector.shape_cast %53 : vector<8xf32> to vector<1x8xf32>
    %55 = vector.broadcast %51 : vector<32x1xf32> to vector<32x8xf32>
    %56 = vector.broadcast %54 : vector<1x8xf32> to vector<32x8xf32>
    %57 = arith.mulf %55, %56 : vector<32x8xf32>
    %58 = arith.addf %50, %57 : vector<32x8xf32>
    %c3 = arith.constant 3 : index
    %c0_30 = arith.constant 0 : index
    %59 = tpu.strided_load %arg11[%c3, %c0_30] {strides = array<i32: 2, 1>} : memref<132x1xf32, #tpu.memory_space<vmem>>, vector<32x1xf32>
    %c3_31 = arith.constant 3 : index
    %c0_32 = arith.constant 0 : index
    %60 = vector.load %arg3[%c3_31, %c0_32] : memref<4x8xf32, #tpu.memory_space<vmem>>, vector<1x8xf32>
    %61 = vector.shape_cast %60 : vector<1x8xf32> to vector<8xf32>
    %62 = vector.shape_cast %61 : vector<8xf32> to vector<1x8xf32>
    %63 = vector.broadcast %59 : vector<32x1xf32> to vector<32x8xf32>
    %64 = vector.broadcast %62 : vector<1x8xf32> to vector<32x8xf32>
    %65 = arith.mulf %63, %64 : vector<32x8xf32>
    %66 = arith.addf %58, %65 : vector<32x8xf32>
    %cst_33 = arith.constant 0.000000e+00 : f32
    %67 = vector.broadcast %cst_33 : f32 to vector<32x8xf32>
    %c66_34 = arith.constant 66 : index
    %c0_35 = arith.constant 0 : index
    %68 = tpu.strided_load %arg11[%c66_34, %c0_35] {strides = array<i32: 2, 1>} : memref<132x1xf32, #tpu.memory_space<vmem>>, vector<32x1xf32>
    %c0_36 = arith.constant 0 : index
    %c0_37 = arith.constant 0 : index
    %69 = vector.load %arg3[%c0_36, %c0_37] : memref<4x8xf32, #tpu.memory_space<vmem>>, vector<1x8xf32>
    %70 = vector.shape_cast %69 : vector<1x8xf32> to vector<8xf32>
    %71 = vector.shape_cast %70 : vector<8xf32> to vector<1x8xf32>
    %72 = vector.broadcast %68 : vector<32x1xf32> to vector<32x8xf32>
    %73 = vector.broadcast %71 : vector<1x8xf32> to vector<32x8xf32>
    %74 = arith.mulf %72, %73 : vector<32x8xf32>
    %75 = arith.addf %67, %74 : vector<32x8xf32>
    %c67_38 = arith.constant 67 : index
    %c0_39 = arith.constant 0 : index
    %76 = tpu.strided_load %arg11[%c67_38, %c0_39] {strides = array<i32: 2, 1>} : memref<132x1xf32, #tpu.memory_space<vmem>>, vector<32x1xf32>
    %c1_40 = arith.constant 1 : index
    %c0_41 = arith.constant 0 : index
    %77 = vector.load %arg3[%c1_40, %c0_41] : memref<4x8xf32, #tpu.memory_space<vmem>>, vector<1x8xf32>
    %78 = vector.shape_cast %77 : vector<1x8xf32> to vector<8xf32>
    %79 = vector.shape_cast %78 : vector<8xf32> to vector<1x8xf32>
    %80 = vector.broadcast %76 : vector<32x1xf32> to vector<32x8xf32>
    %81 = vector.broadcast %79 : vector<1x8xf32> to vector<32x8xf32>
    %82 = arith.mulf %80, %81 : vector<32x8xf32>
    %83 = arith.addf %75, %82 : vector<32x8xf32>
    %c68 = arith.constant 68 : index
    %c0_42 = arith.constant 0 : index
    %84 = tpu.strided_load %arg11[%c68, %c0_42] {strides = array<i32: 2, 1>} : memref<132x1xf32, #tpu.memory_space<vmem>>, vector<32x1xf32>
    %c2_43 = arith.constant 2 : index
    %c0_44 = arith.constant 0 : index
    %85 = vector.load %arg3[%c2_43, %c0_44] : memref<4x8xf32, #tpu.memory_space<vmem>>, vector<1x8xf32>
    %86 = vector.shape_cast %85 : vector<1x8xf32> to vector<8xf32>
    %87 = vector.shape_cast %86 : vector<8xf32> to vector<1x8xf32>
    %88 = vector.broadcast %84 : vector<32x1xf32> to vector<32x8xf32>
    %89 = vector.broadcast %87 : vector<1x8xf32> to vector<32x8xf32>
    %90 = arith.mulf %88, %89 : vector<32x8xf32>
    %91 = arith.addf %83, %90 : vector<32x8xf32>
    %c69 = arith.constant 69 : index
    %c0_45 = arith.constant 0 : index
    %92 = tpu.strided_load %arg11[%c69, %c0_45] {strides = array<i32: 2, 1>} : memref<132x1xf32, #tpu.memory_space<vmem>>, vector<32x1xf32>
    %c3_46 = arith.constant 3 : index
    %c0_47 = arith.constant 0 : index
    %93 = vector.load %arg3[%c3_46, %c0_47] : memref<4x8xf32, #tpu.memory_space<vmem>>, vector<1x8xf32>
    %94 = vector.shape_cast %93 : vector<1x8xf32> to vector<8xf32>
    %95 = vector.shape_cast %94 : vector<8xf32> to vector<1x8xf32>
    %96 = vector.broadcast %92 : vector<32x1xf32> to vector<32x8xf32>
    %97 = vector.broadcast %95 : vector<1x8xf32> to vector<32x8xf32>
    %98 = arith.mulf %96, %97 : vector<32x8xf32>
    %99 = arith.addf %91, %98 : vector<32x8xf32>
    %100 = tpu.concatenate %66, %99 in 0 : vector<32x8xf32>, vector<32x8xf32> -> vector<64x8xf32>
    %c0_48 = arith.constant 0 : index
    %c0_49 = arith.constant 0 : index
    %101 = vector.load %arg5[%c0_48, %c0_49] : memref<4x8xf32, #tpu.memory_space<vmem>>, vector<1x8xf32>
    %102 = vector.shape_cast %101 : vector<1x8xf32> to vector<8xf32>
    %103 = vector.shape_cast %102 : vector<8xf32> to vector<1x8xf32>
    %104 = vector.broadcast %103 : vector<1x8xf32> to vector<64x8xf32>
    %105 = arith.addf %100, %104 : vector<64x8xf32>
    %cst_50 = arith.constant 0.000000e+00 : f32
    %106 = vector.broadcast %cst_50 : f32 to vector<64x8xf32>
    %107 = arith.cmpf oge, %105, %106 : vector<64x8xf32>
    %c2_51 = arith.constant 2 : index
    %108 = memref.load %arg2[%c2_51] : memref<6xf32, #tpu.memory_space<smem>>
    %109 = vector.broadcast %108 : f32 to vector<64x8xf32>
    %110 = arith.mulf %109, %105 : vector<64x8xf32>
    %111 = arith.select %107, %105, %110 : vector<64x8xi1>, vector<64x8xf32>
    %c0_52 = arith.constant 0 : index
    %c0_53 = arith.constant 0 : index
    %112 = vector.load %arg6[%c0_52, %c0_53] : memref<4x8xf32, #tpu.memory_space<vmem>>, vector<1x8xf32>
    %113 = vector.shape_cast %112 : vector<1x8xf32> to vector<8xf32>
    %c0_54 = arith.constant 0 : index
    %c0_55 = arith.constant 0 : index
    %114 = vector.load %arg7[%c0_54, %c0_55] : memref<4x8xf32, #tpu.memory_space<vmem>>, vector<1x8xf32>
    %115 = vector.shape_cast %114 : vector<1x8xf32> to vector<8xf32>
    %cst_56 = arith.constant dense<0.000000e+00> : vector<64xf32>
    %116 = vector.multi_reduction <add>, %111, %cst_56 [1] : vector<64x8xf32> to vector<64xf32>
    %117 = vector.shape_cast %116 : vector<64xf32> to vector<64x1xf32>
    %cst_57 = arith.constant 8.000000e+00 : f32
    %118 = vector.broadcast %cst_57 : f32 to vector<64x1xf32>
    %119 = arith.divf %117, %118 : vector<64x1xf32>
    %120 = vector.broadcast %119 : vector<64x1xf32> to vector<64x8xf32>
    %121 = arith.subf %111, %120 : vector<64x8xf32>
    %122 = arith.mulf %121, %121 : vector<64x8xf32>
    %cst_58 = arith.constant dense<0.000000e+00> : vector<64xf32>
    %123 = vector.multi_reduction <add>, %122, %cst_58 [1] : vector<64x8xf32> to vector<64xf32>
    %124 = vector.shape_cast %123 : vector<64xf32> to vector<64x1xf32>
    %cst_59 = arith.constant 8.000000e+00 : f32
    %125 = vector.broadcast %cst_59 : f32 to vector<64x1xf32>
    %126 = arith.divf %124, %125 : vector<64x1xf32>
    %127 = vector.broadcast %119 : vector<64x1xf32> to vector<64x8xf32>
    %128 = arith.subf %111, %127 : vector<64x8xf32>
    %cst_60 = arith.constant 9.99999974E-6 : f32
    %129 = vector.broadcast %cst_60 : f32 to vector<64x1xf32>
    %130 = arith.addf %126, %129 : vector<64x1xf32>
    %131 = math.rsqrt %130 : vector<64x1xf32>
    %132 = vector.broadcast %131 : vector<64x1xf32> to vector<64x8xf32>
    %133 = arith.mulf %128, %132 : vector<64x8xf32>
    %134 = vector.shape_cast %113 : vector<8xf32> to vector<1x8xf32>
    %135 = vector.broadcast %134 : vector<1x8xf32> to vector<64x8xf32>
    %136 = arith.mulf %133, %135 : vector<64x8xf32>
    %137 = vector.shape_cast %115 : vector<8xf32> to vector<1x8xf32>
    %138 = vector.broadcast %137 : vector<1x8xf32> to vector<64x8xf32>
    %139 = arith.addf %136, %138 : vector<64x8xf32>
    %cst_61 = arith.constant 0.000000e+00 : f32
    %140 = vector.broadcast %cst_61 : f32 to vector<1x8xf32>
    %c0_62 = arith.constant 0 : index
    %c0_63 = arith.constant 0 : index
    %141 = vector.load %arg12[%c0_62, %c0_63] : memref<68x8xf32, #tpu.memory_space<vmem>>, vector<1x8xf32>
    tpu.vector_store %arg12[%c0_62, %c0_63], %140 {strides = array<i32>} : memref<68x8xf32, #tpu.memory_space<vmem>>, vector<1x8xf32>,
    %cst_64 = arith.constant 0.000000e+00 : f32
    %142 = vector.broadcast %cst_64 : f32 to vector<1x8xf32>
    %c33 = arith.constant 33 : index
    %c0_65 = arith.constant 0 : index
    %143 = vector.load %arg12[%c33, %c0_65] : memref<68x8xf32, #tpu.memory_space<vmem>>, vector<1x8xf32>
    tpu.vector_store %arg12[%c33, %c0_65], %142 {strides = array<i32>} : memref<68x8xf32, #tpu.memory_space<vmem>>, vector<1x8xf32>,
    %144 = vector.extract_strided_slice %139 {offsets = [0, 0], sizes = [32, 8], strides = [1, 1]} : vector<64x8xf32> to vector<32x8xf32>
    %c1_66 = arith.constant 1 : index
    %c0_67 = arith.constant 0 : index
    %145 = vector.load %arg12[%c1_66, %c0_67] : memref<68x8xf32, #tpu.memory_space<vmem>>, vector<32x8xf32>
    tpu.vector_store %arg12[%c1_66, %c0_67], %144 {strides = array<i32>} : memref<68x8xf32, #tpu.memory_space<vmem>>, vector<32x8xf32>,
    %cst_68 = arith.constant 0.000000e+00 : f32
    %146 = vector.broadcast %cst_68 : f32 to vector<1x8xf32>
    %c34 = arith.constant 34 : index
    %c0_69 = arith.constant 0 : index
    %147 = vector.load %arg12[%c34, %c0_69] : memref<68x8xf32, #tpu.memory_space<vmem>>, vector<1x8xf32>
    tpu.vector_store %arg12[%c34, %c0_69], %146 {strides = array<i32>} : memref<68x8xf32, #tpu.memory_space<vmem>>, vector<1x8xf32>,
    %cst_70 = arith.constant 0.000000e+00 : f32
    %148 = vector.broadcast %cst_70 : f32 to vector<1x8xf32>
    %c67_71 = arith.constant 67 : index
    %c0_72 = arith.constant 0 : index
    %149 = vector.load %arg12[%c67_71, %c0_72] : memref<68x8xf32, #tpu.memory_space<vmem>>, vector<1x8xf32>
    tpu.vector_store %arg12[%c67_71, %c0_72], %148 {strides = array<i32>} : memref<68x8xf32, #tpu.memory_space<vmem>>, vector<1x8xf32>,
    %150 = vector.extract_strided_slice %139 {offsets = [32, 0], sizes = [32, 8], strides = [1, 1]} : vector<64x8xf32> to vector<32x8xf32>
    %c35 = arith.constant 35 : index
    %c0_73 = arith.constant 0 : index
    %151 = vector.load %arg12[%c35, %c0_73] : memref<68x8xf32, #tpu.memory_space<vmem>>, vector<32x8xf32>
    tpu.vector_store %arg12[%c35, %c0_73], %150 {strides = array<i32>} : memref<68x8xf32, #tpu.memory_space<vmem>>, vector<32x8xf32>,
    %c0_74 = arith.constant 0 : index
    %c0_75 = arith.constant 0 : index
    %152 = tpu.strided_load %arg12[%c0_74, %c0_75] {strides = array<i32: 2, 1>} : memref<68x8xf32, #tpu.memory_space<vmem>>, vector<16x8xf32>
    %c0_76 = arith.constant 0 : index
    %c0_77 = arith.constant 0 : index
    %153 = vector.load %arg15[%c0_76, %c0_77] : memref<32x32xf32, #tpu.memory_space<vmem>>, vector<16x8xf32>
    tpu.vector_store %arg15[%c0_76, %c0_77], %152 {strides = array<i32>} : memref<32x32xf32, #tpu.memory_space<vmem>>, vector<16x8xf32>,
    %c1_78 = arith.constant 1 : index
    %c0_79 = arith.constant 0 : index
    %154 = tpu.strided_load %arg12[%c1_78, %c0_79] {strides = array<i32: 2, 1>} : memref<68x8xf32, #tpu.memory_space<vmem>>, vector<16x8xf32>
    %c0_80 = arith.constant 0 : index
    %c8 = arith.constant 8 : index
    %155 = vector.load %arg15[%c0_80, %c8] : memref<32x32xf32, #tpu.memory_space<vmem>>, vector<16x8xf32>
    tpu.vector_store %arg15[%c0_80, %c8], %154 {strides = array<i32>} : memref<32x32xf32, #tpu.memory_space<vmem>>, vector<16x8xf32>,
    %c2_81 = arith.constant 2 : index
    %c0_82 = arith.constant 0 : index
    %156 = tpu.strided_load %arg12[%c2_81, %c0_82] {strides = array<i32: 2, 1>} : memref<68x8xf32, #tpu.memory_space<vmem>>, vector<16x8xf32>
    %c0_83 = arith.constant 0 : index
    %c16 = arith.constant 16 : index
    %157 = vector.load %arg15[%c0_83, %c16] : memref<32x32xf32, #tpu.memory_space<vmem>>, vector<16x8xf32>
    tpu.vector_store %arg15[%c0_83, %c16], %156 {strides = array<i32>} : memref<32x32xf32, #tpu.memory_space<vmem>>, vector<16x8xf32>,
    %c3_84 = arith.constant 3 : index
    %c0_85 = arith.constant 0 : index
    %158 = tpu.strided_load %arg12[%c3_84, %c0_85] {strides = array<i32: 2, 1>} : memref<68x8xf32, #tpu.memory_space<vmem>>, vector<16x8xf32>
    %c0_86 = arith.constant 0 : index
    %c24 = arith.constant 24 : index
    %159 = vector.load %arg15[%c0_86, %c24] : memref<32x32xf32, #tpu.memory_space<vmem>>, vector<16x8xf32>
    tpu.vector_store %arg15[%c0_86, %c24], %158 {strides = array<i32>} : memref<32x32xf32, #tpu.memory_space<vmem>>, vector<16x8xf32>,
    %c34_87 = arith.constant 34 : index
    %c0_88 = arith.constant 0 : index
    %160 = tpu.strided_load %arg12[%c34_87, %c0_88] {strides = array<i32: 2, 1>} : memref<68x8xf32, #tpu.memory_space<vmem>>, vector<16x8xf32>
    %c16_89 = arith.constant 16 : index
    %c0_90 = arith.constant 0 : index
    %161 = vector.load %arg15[%c16_89, %c0_90] : memref<32x32xf32, #tpu.memory_space<vmem>>, vector<16x8xf32>
    tpu.vector_store %arg15[%c16_89, %c0_90], %160 {strides = array<i32>} : memref<32x32xf32, #tpu.memory_space<vmem>>, vector<16x8xf32>,
    %c35_91 = arith.constant 35 : index
    %c0_92 = arith.constant 0 : index
    %162 = tpu.strided_load %arg12[%c35_91, %c0_92] {strides = array<i32: 2, 1>} : memref<68x8xf32, #tpu.memory_space<vmem>>, vector<16x8xf32>
    %c16_93 = arith.constant 16 : index
    %c8_94 = arith.constant 8 : index
    %163 = vector.load %arg15[%c16_93, %c8_94] : memref<32x32xf32, #tpu.memory_space<vmem>>, vector<16x8xf32>
    tpu.vector_store %arg15[%c16_93, %c8_94], %162 {strides = array<i32>} : memref<32x32xf32, #tpu.memory_space<vmem>>, vector<16x8xf32>,
    %c36 = arith.constant 36 : index
    %c0_95 = arith.constant 0 : index
    %164 = tpu.strided_load %arg12[%c36, %c0_95] {strides = array<i32: 2, 1>} : memref<68x8xf32, #tpu.memory_space<vmem>>, vector<16x8xf32>
    %c16_96 = arith.constant 16 : index
    %c16_97 = arith.constant 16 : index
    %165 = vector.load %arg15[%c16_96, %c16_97] : memref<32x32xf32, #tpu.memory_space<vmem>>, vector<16x8xf32>
    tpu.vector_store %arg15[%c16_96, %c16_97], %164 {strides = array<i32>} : memref<32x32xf32, #tpu.memory_space<vmem>>, vector<16x8xf32>,
    %c37 = arith.constant 37 : index
    %c0_98 = arith.constant 0 : index
    %166 = tpu.strided_load %arg12[%c37, %c0_98] {strides = array<i32: 2, 1>} : memref<68x8xf32, #tpu.memory_space<vmem>>, vector<16x8xf32>
    %c16_99 = arith.constant 16 : index
    %c24_100 = arith.constant 24 : index
    %167 = vector.load %arg15[%c16_99, %c24_100] : memref<32x32xf32, #tpu.memory_space<vmem>>, vector<16x8xf32>
    tpu.vector_store %arg15[%c16_99, %c24_100], %166 {strides = array<i32>} : memref<32x32xf32, #tpu.memory_space<vmem>>, vector<16x8xf32>,
    %c0_101 = arith.constant 0 : index
    %c0_102 = arith.constant 0 : index
    %168 = vector.load %arg15[%c0_101, %c0_102] : memref<32x32xf32, #tpu.memory_space<vmem>>, vector<32x32xf32>
    %c0_103 = arith.constant 0 : index
    %c0_104 = arith.constant 0 : index
    %c0_105 = arith.constant 0 : index
    %169 = vector.load %arg4[%c0_103, %c0_104, %c0_105] : memref<3x32x8xf32, #tpu.memory_space<vmem>>, vector<1x32x8xf32>
    %170 = vector.shape_cast %169 : vector<1x32x8xf32> to vector<32x8xf32>
    %cst_106 = arith.constant dense<0.000000e+00> : vector<32x8xf32>
    %171 = tpu.matmul %168, %170, %cst_106 {dimension_numbers = #tpu.dot_dimension_numbers<[1], [0], [0], [1], [0, 0, 1, 1], [], []>} : vector<32x32xf32>, vector<32x8xf32>, vector<32x8xf32> -> vector<32x8xf32>
    %c1_107 = arith.constant 1 : index
    %c0_108 = arith.constant 0 : index
    %172 = vector.load %arg5[%c1_107, %c0_108] : memref<4x8xf32, #tpu.memory_space<vmem>>, vector<1x8xf32>
    %173 = vector.shape_cast %172 : vector<1x8xf32> to vector<8xf32>
    %174 = vector.shape_cast %173 : vector<8xf32> to vector<1x8xf32>
    %175 = vector.broadcast %174 : vector<1x8xf32> to vector<32x8xf32>
    %176 = arith.addf %171, %175 : vector<32x8xf32>
    %cst_109 = arith.constant 0.000000e+00 : f32
    %177 = vector.broadcast %cst_109 : f32 to vector<32x8xf32>
    %178 = arith.cmpf oge, %176, %177 : vector<32x8xf32>
    %c3_110 = arith.constant 3 : index
    %179 = memref.load %arg2[%c3_110] : memref<6xf32, #tpu.memory_space<smem>>
    %180 = vector.broadcast %179 : f32 to vector<32x8xf32>
    %181 = arith.mulf %180, %176 : vector<32x8xf32>
    %182 = arith.select %178, %176, %181 : vector<32x8xi1>, vector<32x8xf32>
    %c1_111 = arith.constant 1 : index
    %c0_112 = arith.constant 0 : index
    %183 = vector.load %arg6[%c1_111, %c0_112] : memref<4x8xf32, #tpu.memory_space<vmem>>, vector<1x8xf32>
    %184 = vector.shape_cast %183 : vector<1x8xf32> to vector<8xf32>
    %c1_113 = arith.constant 1 : index
    %c0_114 = arith.constant 0 : index
    %185 = vector.load %arg7[%c1_113, %c0_114] : memref<4x8xf32, #tpu.memory_space<vmem>>, vector<1x8xf32>
    %186 = vector.shape_cast %185 : vector<1x8xf32> to vector<8xf32>
    %cst_115 = arith.constant dense<0.000000e+00> : vector<32xf32>
    %187 = vector.multi_reduction <add>, %182, %cst_115 [1] : vector<32x8xf32> to vector<32xf32>
    %188 = vector.shape_cast %187 : vector<32xf32> to vector<32x1xf32>
    %cst_116 = arith.constant 8.000000e+00 : f32
    %189 = vector.broadcast %cst_116 : f32 to vector<32x1xf32>
    %190 = arith.divf %188, %189 : vector<32x1xf32>
    %191 = vector.broadcast %190 : vector<32x1xf32> to vector<32x8xf32>
    %192 = arith.subf %182, %191 : vector<32x8xf32>
    %193 = arith.mulf %192, %192 : vector<32x8xf32>
    %cst_117 = arith.constant dense<0.000000e+00> : vector<32xf32>
    %194 = vector.multi_reduction <add>, %193, %cst_117 [1] : vector<32x8xf32> to vector<32xf32>
    %195 = vector.shape_cast %194 : vector<32xf32> to vector<32x1xf32>
    %cst_118 = arith.constant 8.000000e+00 : f32
    %196 = vector.broadcast %cst_118 : f32 to vector<32x1xf32>
    %197 = arith.divf %195, %196 : vector<32x1xf32>
    %198 = vector.broadcast %190 : vector<32x1xf32> to vector<32x8xf32>
    %199 = arith.subf %182, %198 : vector<32x8xf32>
    %cst_119 = arith.constant 9.99999974E-6 : f32
    %200 = vector.broadcast %cst_119 : f32 to vector<32x1xf32>
    %201 = arith.addf %197, %200 : vector<32x1xf32>
    %202 = math.rsqrt %201 : vector<32x1xf32>
    %203 = vector.broadcast %202 : vector<32x1xf32> to vector<32x8xf32>
    %204 = arith.mulf %199, %203 : vector<32x8xf32>
    %205 = vector.shape_cast %184 : vector<8xf32> to vector<1x8xf32>
    %206 = vector.broadcast %205 : vector<1x8xf32> to vector<32x8xf32>
    %207 = arith.mulf %204, %206 : vector<32x8xf32>
    %208 = vector.shape_cast %186 : vector<8xf32> to vector<1x8xf32>
    %209 = vector.broadcast %208 : vector<1x8xf32> to vector<32x8xf32>
    %210 = arith.addf %207, %209 : vector<32x8xf32>
    %cst_120 = arith.constant 0.000000e+00 : f32
    %211 = vector.broadcast %cst_120 : f32 to vector<1x8xf32>
    %c0_121 = arith.constant 0 : index
    %c0_122 = arith.constant 0 : index
    %212 = vector.load %arg13[%c0_121, %c0_122] : memref<36x8xf32, #tpu.memory_space<vmem>>, vector<1x8xf32>
    tpu.vector_store %arg13[%c0_121, %c0_122], %211 {strides = array<i32>} : memref<36x8xf32, #tpu.memory_space<vmem>>, vector<1x8xf32>,
    %cst_123 = arith.constant 0.000000e+00 : f32
    %213 = vector.broadcast %cst_123 : f32 to vector<1x8xf32>
    %c17 = arith.constant 17 : index
    %c0_124 = arith.constant 0 : index
    %214 = vector.load %arg13[%c17, %c0_124] : memref<36x8xf32, #tpu.memory_space<vmem>>, vector<1x8xf32>
    tpu.vector_store %arg13[%c17, %c0_124], %213 {strides = array<i32>} : memref<36x8xf32, #tpu.memory_space<vmem>>, vector<1x8xf32>,
    %215 = vector.extract_strided_slice %210 {offsets = [0, 0], sizes = [16, 8], strides = [1, 1]} : vector<32x8xf32> to vector<16x8xf32>
    %c1_125 = arith.constant 1 : index
    %c0_126 = arith.constant 0 : index
    %216 = vector.load %arg13[%c1_125, %c0_126] : memref<36x8xf32, #tpu.memory_space<vmem>>, vector<16x8xf32>
    tpu.vector_store %arg13[%c1_125, %c0_126], %215 {strides = array<i32>} : memref<36x8xf32, #tpu.memory_space<vmem>>, vector<16x8xf32>,
    %cst_127 = arith.constant 0.000000e+00 : f32
    %217 = vector.broadcast %cst_127 : f32 to vector<1x8xf32>
    %c18 = arith.constant 18 : index
    %c0_128 = arith.constant 0 : index
    %218 = vector.load %arg13[%c18, %c0_128] : memref<36x8xf32, #tpu.memory_space<vmem>>, vector<1x8xf32>
    tpu.vector_store %arg13[%c18, %c0_128], %217 {strides = array<i32>} : memref<36x8xf32, #tpu.memory_space<vmem>>, vector<1x8xf32>,
    %cst_129 = arith.constant 0.000000e+00 : f32
    %219 = vector.broadcast %cst_129 : f32 to vector<1x8xf32>
    %c35_130 = arith.constant 35 : index
    %c0_131 = arith.constant 0 : index
    %220 = vector.load %arg13[%c35_130, %c0_131] : memref<36x8xf32, #tpu.memory_space<vmem>>, vector<1x8xf32>
    tpu.vector_store %arg13[%c35_130, %c0_131], %219 {strides = array<i32>} : memref<36x8xf32, #tpu.memory_space<vmem>>, vector<1x8xf32>,
    %221 = vector.extract_strided_slice %210 {offsets = [16, 0], sizes = [16, 8], strides = [1, 1]} : vector<32x8xf32> to vector<16x8xf32>
    %c19 = arith.constant 19 : index
    %c0_132 = arith.constant 0 : index
    %222 = vector.load %arg13[%c19, %c0_132] : memref<36x8xf32, #tpu.memory_space<vmem>>, vector<16x8xf32>
    tpu.vector_store %arg13[%c19, %c0_132], %221 {strides = array<i32>} : memref<36x8xf32, #tpu.memory_space<vmem>>, vector<16x8xf32>,
    %c0_133 = arith.constant 0 : index
    %c0_134 = arith.constant 0 : index
    %223 = tpu.strided_load %arg13[%c0_133, %c0_134] {strides = array<i32: 2, 1>} : memref<36x8xf32, #tpu.memory_space<vmem>>, vector<8x8xf32>
    %c0_135 = arith.constant 0 : index
    %c0_136 = arith.constant 0 : index
    %224 = vector.load %arg15[%c0_135, %c0_136] : memref<32x32xf32, #tpu.memory_space<vmem>>, vector<8x8xf32>
    tpu.vector_store %arg15[%c0_135, %c0_136], %223 {strides = array<i32>} : memref<32x32xf32, #tpu.memory_space<vmem>>, vector<8x8xf32>,
    %c1_137 = arith.constant 1 : index
    %c0_138 = arith.constant 0 : index
    %225 = tpu.strided_load %arg13[%c1_137, %c0_138] {strides = array<i32: 2, 1>} : memref<36x8xf32, #tpu.memory_space<vmem>>, vector<8x8xf32>
    %c0_139 = arith.constant 0 : index
    %c8_140 = arith.constant 8 : index
    %226 = vector.load %arg15[%c0_139, %c8_140] : memref<32x32xf32, #tpu.memory_space<vmem>>, vector<8x8xf32>
    tpu.vector_store %arg15[%c0_139, %c8_140], %225 {strides = array<i32>} : memref<32x32xf32, #tpu.memory_space<vmem>>, vector<8x8xf32>,
    %c2_141 = arith.constant 2 : index
    %c0_142 = arith.constant 0 : index
    %227 = tpu.strided_load %arg13[%c2_141, %c0_142] {strides = array<i32: 2, 1>} : memref<36x8xf32, #tpu.memory_space<vmem>>, vector<8x8xf32>
    %c0_143 = arith.constant 0 : index
    %c16_144 = arith.constant 16 : index
    %228 = vector.load %arg15[%c0_143, %c16_144] : memref<32x32xf32, #tpu.memory_space<vmem>>, vector<8x8xf32>
    tpu.vector_store %arg15[%c0_143, %c16_144], %227 {strides = array<i32>} : memref<32x32xf32, #tpu.memory_space<vmem>>, vector<8x8xf32>,
    %c3_145 = arith.constant 3 : index
    %c0_146 = arith.constant 0 : index
    %229 = tpu.strided_load %arg13[%c3_145, %c0_146] {strides = array<i32: 2, 1>} : memref<36x8xf32, #tpu.memory_space<vmem>>, vector<8x8xf32>
    %c0_147 = arith.constant 0 : index
    %c24_148 = arith.constant 24 : index
    %230 = vector.load %arg15[%c0_147, %c24_148] : memref<32x32xf32, #tpu.memory_space<vmem>>, vector<8x8xf32>
    tpu.vector_store %arg15[%c0_147, %c24_148], %229 {strides = array<i32>} : memref<32x32xf32, #tpu.memory_space<vmem>>, vector<8x8xf32>,
    %c18_149 = arith.constant 18 : index
    %c0_150 = arith.constant 0 : index
    %231 = tpu.strided_load %arg13[%c18_149, %c0_150] {strides = array<i32: 2, 1>} : memref<36x8xf32, #tpu.memory_space<vmem>>, vector<8x8xf32>
    %c8_151 = arith.constant 8 : index
    %c0_152 = arith.constant 0 : index
    %232 = vector.load %arg15[%c8_151, %c0_152] : memref<32x32xf32, #tpu.memory_space<vmem>>, vector<8x8xf32>
    tpu.vector_store %arg15[%c8_151, %c0_152], %231 {strides = array<i32>} : memref<32x32xf32, #tpu.memory_space<vmem>>, vector<8x8xf32>,
    %c19_153 = arith.constant 19 : index
    %c0_154 = arith.constant 0 : index
    %233 = tpu.strided_load %arg13[%c19_153, %c0_154] {strides = array<i32: 2, 1>} : memref<36x8xf32, #tpu.memory_space<vmem>>, vector<8x8xf32>
    %c8_155 = arith.constant 8 : index
    %c8_156 = arith.constant 8 : index
    %234 = vector.load %arg15[%c8_155, %c8_156] : memref<32x32xf32, #tpu.memory_space<vmem>>, vector<8x8xf32>
    tpu.vector_store %arg15[%c8_155, %c8_156], %233 {strides = array<i32>} : memref<32x32xf32, #tpu.memory_space<vmem>>, vector<8x8xf32>,
    %c20 = arith.constant 20 : index
    %c0_157 = arith.constant 0 : index
    %235 = tpu.strided_load %arg13[%c20, %c0_157] {strides = array<i32: 2, 1>} : memref<36x8xf32, #tpu.memory_space<vmem>>, vector<8x8xf32>
    %c8_158 = arith.constant 8 : index
    %c16_159 = arith.constant 16 : index
    %236 = vector.load %arg15[%c8_158, %c16_159] : memref<32x32xf32, #tpu.memory_space<vmem>>, vector<8x8xf32>
    tpu.vector_store %arg15[%c8_158, %c16_159], %235 {strides = array<i32>} : memref<32x32xf32, #tpu.memory_space<vmem>>, vector<8x8xf32>,
    %c21 = arith.constant 21 : index
    %c0_160 = arith.constant 0 : index
    %237 = tpu.strided_load %arg13[%c21, %c0_160] {strides = array<i32: 2, 1>} : memref<36x8xf32, #tpu.memory_space<vmem>>, vector<8x8xf32>
    %c8_161 = arith.constant 8 : index
    %c24_162 = arith.constant 24 : index
    %238 = vector.load %arg15[%c8_161, %c24_162] : memref<32x32xf32, #tpu.memory_space<vmem>>, vector<8x8xf32>
    tpu.vector_store %arg15[%c8_161, %c24_162], %237 {strides = array<i32>} : memref<32x32xf32, #tpu.memory_space<vmem>>, vector<8x8xf32>,
    %c0_163 = arith.constant 0 : index
    %c0_164 = arith.constant 0 : index
    %239 = vector.load %arg15[%c0_163, %c0_164] : memref<32x32xf32, #tpu.memory_space<vmem>>, vector<16x32xf32>
    %c1_165 = arith.constant 1 : index
    %c0_166 = arith.constant 0 : index
    %c0_167 = arith.constant 0 : index
    %240 = vector.load %arg4[%c1_165, %c0_166, %c0_167] : memref<3x32x8xf32, #tpu.memory_space<vmem>>, vector<1x32x8xf32>
    %241 = vector.shape_cast %240 : vector<1x32x8xf32> to vector<32x8xf32>
    %cst_168 = arith.constant dense<0.000000e+00> : vector<16x8xf32>
    %242 = tpu.matmul %239, %241, %cst_168 {dimension_numbers = #tpu.dot_dimension_numbers<[1], [0], [0], [1], [0, 0, 1, 1], [], []>} : vector<16x32xf32>, vector<32x8xf32>, vector<16x8xf32> -> vector<16x8xf32>
    %c2_169 = arith.constant 2 : index
    %c0_170 = arith.constant 0 : index
    %243 = vector.load %arg5[%c2_169, %c0_170] : memref<4x8xf32, #tpu.memory_space<vmem>>, vector<1x8xf32>
    %244 = vector.shape_cast %243 : vector<1x8xf32> to vector<8xf32>
    %245 = vector.shape_cast %244 : vector<8xf32> to vector<1x8xf32>
    %246 = vector.broadcast %245 : vector<1x8xf32> to vector<16x8xf32>
    %247 = arith.addf %242, %246 : vector<16x8xf32>
    %cst_171 = arith.constant 0.000000e+00 : f32
    %248 = vector.broadcast %cst_171 : f32 to vector<16x8xf32>
    %249 = arith.cmpf oge, %247, %248 : vector<16x8xf32>
    %c4 = arith.constant 4 : index
    %250 = memref.load %arg2[%c4] : memref<6xf32, #tpu.memory_space<smem>>
    %251 = vector.broadcast %250 : f32 to vector<16x8xf32>
    %252 = arith.mulf %251, %247 : vector<16x8xf32>
    %253 = arith.select %249, %247, %252 : vector<16x8xi1>, vector<16x8xf32>
    %c2_172 = arith.constant 2 : index
    %c0_173 = arith.constant 0 : index
    %254 = vector.load %arg6[%c2_172, %c0_173] : memref<4x8xf32, #tpu.memory_space<vmem>>, vector<1x8xf32>
    %255 = vector.shape_cast %254 : vector<1x8xf32> to vector<8xf32>
    %c2_174 = arith.constant 2 : index
    %c0_175 = arith.constant 0 : index
    %256 = vector.load %arg7[%c2_174, %c0_175] : memref<4x8xf32, #tpu.memory_space<vmem>>, vector<1x8xf32>
    %257 = vector.shape_cast %256 : vector<1x8xf32> to vector<8xf32>
    %cst_176 = arith.constant dense<0.000000e+00> : vector<16xf32>
    %258 = vector.multi_reduction <add>, %253, %cst_176 [1] : vector<16x8xf32> to vector<16xf32>
    %259 = vector.shape_cast %258 : vector<16xf32> to vector<16x1xf32>
    %cst_177 = arith.constant 8.000000e+00 : f32
    %260 = vector.broadcast %cst_177 : f32 to vector<16x1xf32>
    %261 = arith.divf %259, %260 : vector<16x1xf32>
    %262 = vector.broadcast %261 : vector<16x1xf32> to vector<16x8xf32>
    %263 = arith.subf %253, %262 : vector<16x8xf32>
    %264 = arith.mulf %263, %263 : vector<16x8xf32>
    %cst_178 = arith.constant dense<0.000000e+00> : vector<16xf32>
    %265 = vector.multi_reduction <add>, %264, %cst_178 [1] : vector<16x8xf32> to vector<16xf32>
    %266 = vector.shape_cast %265 : vector<16xf32> to vector<16x1xf32>
    %cst_179 = arith.constant 8.000000e+00 : f32
    %267 = vector.broadcast %cst_179 : f32 to vector<16x1xf32>
    %268 = arith.divf %266, %267 : vector<16x1xf32>
    %269 = vector.broadcast %261 : vector<16x1xf32> to vector<16x8xf32>
    %270 = arith.subf %253, %269 : vector<16x8xf32>
    %cst_180 = arith.constant 9.99999974E-6 : f32
    %271 = vector.broadcast %cst_180 : f32 to vector<16x1xf32>
    %272 = arith.addf %268, %271 : vector<16x1xf32>
    %273 = math.rsqrt %272 : vector<16x1xf32>
    %274 = vector.broadcast %273 : vector<16x1xf32> to vector<16x8xf32>
    %275 = arith.mulf %270, %274 : vector<16x8xf32>
    %276 = vector.shape_cast %255 : vector<8xf32> to vector<1x8xf32>
    %277 = vector.broadcast %276 : vector<1x8xf32> to vector<16x8xf32>
    %278 = arith.mulf %275, %277 : vector<16x8xf32>
    %279 = vector.shape_cast %257 : vector<8xf32> to vector<1x8xf32>
    %280 = vector.broadcast %279 : vector<1x8xf32> to vector<16x8xf32>
    %281 = arith.addf %278, %280 : vector<16x8xf32>
    %cst_181 = arith.constant 0.000000e+00 : f32
    %282 = vector.broadcast %cst_181 : f32 to vector<1x8xf32>
    %c0_182 = arith.constant 0 : index
    %c0_183 = arith.constant 0 : index
    %283 = vector.load %arg14[%c0_182, %c0_183] : memref<20x8xf32, #tpu.memory_space<vmem>>, vector<1x8xf32>
    tpu.vector_store %arg14[%c0_182, %c0_183], %282 {strides = array<i32>} : memref<20x8xf32, #tpu.memory_space<vmem>>, vector<1x8xf32>,
    %cst_184 = arith.constant 0.000000e+00 : f32
    %284 = vector.broadcast %cst_184 : f32 to vector<1x8xf32>
    %c9 = arith.constant 9 : index
    %c0_185 = arith.constant 0 : index
    %285 = vector.load %arg14[%c9, %c0_185] : memref<20x8xf32, #tpu.memory_space<vmem>>, vector<1x8xf32>
    tpu.vector_store %arg14[%c9, %c0_185], %284 {strides = array<i32>} : memref<20x8xf32, #tpu.memory_space<vmem>>, vector<1x8xf32>,
    %286 = vector.extract_strided_slice %281 {offsets = [0, 0], sizes = [8, 8], strides = [1, 1]} : vector<16x8xf32> to vector<8x8xf32>
    %c1_186 = arith.constant 1 : index
    %c0_187 = arith.constant 0 : index
    %287 = vector.load %arg14[%c1_186, %c0_187] : memref<20x8xf32, #tpu.memory_space<vmem>>, vector<8x8xf32>
    tpu.vector_store %arg14[%c1_186, %c0_187], %286 {strides = array<i32>} : memref<20x8xf32, #tpu.memory_space<vmem>>, vector<8x8xf32>,
    %cst_188 = arith.constant 0.000000e+00 : f32
    %288 = vector.broadcast %cst_188 : f32 to vector<1x8xf32>
    %c10 = arith.constant 10 : index
    %c0_189 = arith.constant 0 : index
    %289 = vector.load %arg14[%c10, %c0_189] : memref<20x8xf32, #tpu.memory_space<vmem>>, vector<1x8xf32>
    tpu.vector_store %arg14[%c10, %c0_189], %288 {strides = array<i32>} : memref<20x8xf32, #tpu.memory_space<vmem>>, vector<1x8xf32>,
    %cst_190 = arith.constant 0.000000e+00 : f32
    %290 = vector.broadcast %cst_190 : f32 to vector<1x8xf32>
    %c19_191 = arith.constant 19 : index
    %c0_192 = arith.constant 0 : index
    %291 = vector.load %arg14[%c19_191, %c0_192] : memref<20x8xf32, #tpu.memory_space<vmem>>, vector<1x8xf32>
    tpu.vector_store %arg14[%c19_191, %c0_192], %290 {strides = array<i32>} : memref<20x8xf32, #tpu.memory_space<vmem>>, vector<1x8xf32>,
    %292 = vector.extract_strided_slice %281 {offsets = [8, 0], sizes = [8, 8], strides = [1, 1]} : vector<16x8xf32> to vector<8x8xf32>
    %c11 = arith.constant 11 : index
    %c0_193 = arith.constant 0 : index
    %293 = vector.load %arg14[%c11, %c0_193] : memref<20x8xf32, #tpu.memory_space<vmem>>, vector<8x8xf32>
    tpu.vector_store %arg14[%c11, %c0_193], %292 {strides = array<i32>} : memref<20x8xf32, #tpu.memory_space<vmem>>, vector<8x8xf32>,
    %c0_194 = arith.constant 0 : index
    %c0_195 = arith.constant 0 : index
    %294 = tpu.strided_load %arg14[%c0_194, %c0_195] {strides = array<i32: 2, 1>} : memref<20x8xf32, #tpu.memory_space<vmem>>, vector<4x8xf32>
    %c0_196 = arith.constant 0 : index
    %c0_197 = arith.constant 0 : index
    %295 = vector.load %arg15[%c0_196, %c0_197] : memref<32x32xf32, #tpu.memory_space<vmem>>, vector<4x8xf32>
    tpu.vector_store %arg15[%c0_196, %c0_197], %294 {strides = array<i32>} : memref<32x32xf32, #tpu.memory_space<vmem>>, vector<4x8xf32>,
    %c1_198 = arith.constant 1 : index
    %c0_199 = arith.constant 0 : index
    %296 = tpu.strided_load %arg14[%c1_198, %c0_199] {strides = array<i32: 2, 1>} : memref<20x8xf32, #tpu.memory_space<vmem>>, vector<4x8xf32>
    %c0_200 = arith.constant 0 : index
    %c8_201 = arith.constant 8 : index
    %297 = vector.load %arg15[%c0_200, %c8_201] : memref<32x32xf32, #tpu.memory_space<vmem>>, vector<4x8xf32>
    tpu.vector_store %arg15[%c0_200, %c8_201], %296 {strides = array<i32>} : memref<32x32xf32, #tpu.memory_space<vmem>>, vector<4x8xf32>,
    %c2_202 = arith.constant 2 : index
    %c0_203 = arith.constant 0 : index
    %298 = tpu.strided_load %arg14[%c2_202, %c0_203] {strides = array<i32: 2, 1>} : memref<20x8xf32, #tpu.memory_space<vmem>>, vector<4x8xf32>
    %c0_204 = arith.constant 0 : index
    %c16_205 = arith.constant 16 : index
    %299 = vector.load %arg15[%c0_204, %c16_205] : memref<32x32xf32, #tpu.memory_space<vmem>>, vector<4x8xf32>
    tpu.vector_store %arg15[%c0_204, %c16_205], %298 {strides = array<i32>} : memref<32x32xf32, #tpu.memory_space<vmem>>, vector<4x8xf32>,
    %c3_206 = arith.constant 3 : index
    %c0_207 = arith.constant 0 : index
    %300 = tpu.strided_load %arg14[%c3_206, %c0_207] {strides = array<i32: 2, 1>} : memref<20x8xf32, #tpu.memory_space<vmem>>, vector<4x8xf32>
    %c0_208 = arith.constant 0 : index
    %c24_209 = arith.constant 24 : index
    %301 = vector.load %arg15[%c0_208, %c24_209] : memref<32x32xf32, #tpu.memory_space<vmem>>, vector<4x8xf32>
    tpu.vector_store %arg15[%c0_208, %c24_209], %300 {strides = array<i32>} : memref<32x32xf32, #tpu.memory_space<vmem>>, vector<4x8xf32>,
    %c10_210 = arith.constant 10 : index
    %c0_211 = arith.constant 0 : index
    %302 = tpu.strided_load %arg14[%c10_210, %c0_211] {strides = array<i32: 2, 1>} : memref<20x8xf32, #tpu.memory_space<vmem>>, vector<4x8xf32>
    %c4_212 = arith.constant 4 : index
    %c0_213 = arith.constant 0 : index
    %303 = vector.load %arg15[%c4_212, %c0_213] : memref<32x32xf32, #tpu.memory_space<vmem>>, vector<4x8xf32>
    tpu.vector_store %arg15[%c4_212, %c0_213], %302 {strides = array<i32>} : memref<32x32xf32, #tpu.memory_space<vmem>>, vector<4x8xf32>,
    %c11_214 = arith.constant 11 : index
    %c0_215 = arith.constant 0 : index
    %304 = tpu.strided_load %arg14[%c11_214, %c0_215] {strides = array<i32: 2, 1>} : memref<20x8xf32, #tpu.memory_space<vmem>>, vector<4x8xf32>
    %c4_216 = arith.constant 4 : index
    %c8_217 = arith.constant 8 : index
    %305 = vector.load %arg15[%c4_216, %c8_217] : memref<32x32xf32, #tpu.memory_space<vmem>>, vector<4x8xf32>
    tpu.vector_store %arg15[%c4_216, %c8_217], %304 {strides = array<i32>} : memref<32x32xf32, #tpu.memory_space<vmem>>, vector<4x8xf32>,
    %c12 = arith.constant 12 : index
    %c0_218 = arith.constant 0 : index
    %306 = tpu.strided_load %arg14[%c12, %c0_218] {strides = array<i32: 2, 1>} : memref<20x8xf32, #tpu.memory_space<vmem>>, vector<4x8xf32>
    %c4_219 = arith.constant 4 : index
    %c16_220 = arith.constant 16 : index
    %307 = vector.load %arg15[%c4_219, %c16_220] : memref<32x32xf32, #tpu.memory_space<vmem>>, vector<4x8xf32>
    tpu.vector_store %arg15[%c4_219, %c16_220], %306 {strides = array<i32>} : memref<32x32xf32, #tpu.memory_space<vmem>>, vector<4x8xf32>,
    %c13 = arith.constant 13 : index
    %c0_221 = arith.constant 0 : index
    %308 = tpu.strided_load %arg14[%c13, %c0_221] {strides = array<i32: 2, 1>} : memref<20x8xf32, #tpu.memory_space<vmem>>, vector<4x8xf32>
    %c4_222 = arith.constant 4 : index
    %c24_223 = arith.constant 24 : index
    %309 = vector.load %arg15[%c4_222, %c24_223] : memref<32x32xf32, #tpu.memory_space<vmem>>, vector<4x8xf32>
    tpu.vector_store %arg15[%c4_222, %c24_223], %308 {strides = array<i32>} : memref<32x32xf32, #tpu.memory_space<vmem>>, vector<4x8xf32>,
    %c0_224 = arith.constant 0 : index
    %c0_225 = arith.constant 0 : index
    %310 = vector.load %arg15[%c0_224, %c0_225] : memref<32x32xf32, #tpu.memory_space<vmem>>, vector<8x32xf32>
    %c2_226 = arith.constant 2 : index
    %c0_227 = arith.constant 0 : index
    %c0_228 = arith.constant 0 : index
    %311 = vector.load %arg4[%c2_226, %c0_227, %c0_228] : memref<3x32x8xf32, #tpu.memory_space<vmem>>, vector<1x32x8xf32>
    %312 = vector.shape_cast %311 : vector<1x32x8xf32> to vector<32x8xf32>
    %cst_229 = arith.constant dense<0.000000e+00> : vector<8x8xf32>
    %313 = tpu.matmul %310, %312, %cst_229 {dimension_numbers = #tpu.dot_dimension_numbers<[1], [0], [0], [1], [0, 0, 1, 1], [], []>} : vector<8x32xf32>, vector<32x8xf32>, vector<8x8xf32> -> vector<8x8xf32>
    %c3_230 = arith.constant 3 : index
    %c0_231 = arith.constant 0 : index
    %314 = vector.load %arg5[%c3_230, %c0_231] : memref<4x8xf32, #tpu.memory_space<vmem>>, vector<1x8xf32>
    %315 = vector.shape_cast %314 : vector<1x8xf32> to vector<8xf32>
    %316 = vector.shape_cast %315 : vector<8xf32> to vector<1x8xf32>
    %317 = vector.broadcast %316 : vector<1x8xf32> to vector<8x8xf32>
    %318 = arith.addf %313, %317 : vector<8x8xf32>
    %cst_232 = arith.constant 0.000000e+00 : f32
    %319 = vector.broadcast %cst_232 : f32 to vector<8x8xf32>
    %320 = arith.cmpf oge, %318, %319 : vector<8x8xf32>
    %c5 = arith.constant 5 : index
    %321 = memref.load %arg2[%c5] : memref<6xf32, #tpu.memory_space<smem>>
    %322 = vector.broadcast %321 : f32 to vector<8x8xf32>
    %323 = arith.mulf %322, %318 : vector<8x8xf32>
    %324 = arith.select %320, %318, %323 : vector<8x8xi1>, vector<8x8xf32>
    %c3_233 = arith.constant 3 : index
    %c0_234 = arith.constant 0 : index
    %325 = vector.load %arg6[%c3_233, %c0_234] : memref<4x8xf32, #tpu.memory_space<vmem>>, vector<1x8xf32>
    %326 = vector.shape_cast %325 : vector<1x8xf32> to vector<8xf32>
    %c3_235 = arith.constant 3 : index
    %c0_236 = arith.constant 0 : index
    %327 = vector.load %arg7[%c3_235, %c0_236] : memref<4x8xf32, #tpu.memory_space<vmem>>, vector<1x8xf32>
    %328 = vector.shape_cast %327 : vector<1x8xf32> to vector<8xf32>
    %cst_237 = arith.constant dense<0.000000e+00> : vector<8xf32>
    %329 = vector.multi_reduction <add>, %324, %cst_237 [1] : vector<8x8xf32> to vector<8xf32>
    %330 = vector.shape_cast %329 : vector<8xf32> to vector<8x1xf32>
    %cst_238 = arith.constant 8.000000e+00 : f32
    %331 = vector.broadcast %cst_238 : f32 to vector<8x1xf32>
    %332 = arith.divf %330, %331 : vector<8x1xf32>
    %333 = vector.broadcast %332 : vector<8x1xf32> to vector<8x8xf32>
    %334 = arith.subf %324, %333 : vector<8x8xf32>
    %335 = arith.mulf %334, %334 : vector<8x8xf32>
    %cst_239 = arith.constant dense<0.000000e+00> : vector<8xf32>
    %336 = vector.multi_reduction <add>, %335, %cst_239 [1] : vector<8x8xf32> to vector<8xf32>
    %337 = vector.shape_cast %336 : vector<8xf32> to vector<8x1xf32>
    %cst_240 = arith.constant 8.000000e+00 : f32
    %338 = vector.broadcast %cst_240 : f32 to vector<8x1xf32>
    %339 = arith.divf %337, %338 : vector<8x1xf32>
    %340 = vector.broadcast %332 : vector<8x1xf32> to vector<8x8xf32>
    %341 = arith.subf %324, %340 : vector<8x8xf32>
    %cst_241 = arith.constant 9.99999974E-6 : f32
    %342 = vector.broadcast %cst_241 : f32 to vector<8x1xf32>
    %343 = arith.addf %339, %342 : vector<8x1xf32>
    %344 = math.rsqrt %343 : vector<8x1xf32>
    %345 = vector.broadcast %344 : vector<8x1xf32> to vector<8x8xf32>
    %346 = arith.mulf %341, %345 : vector<8x8xf32>
    %347 = vector.shape_cast %326 : vector<8xf32> to vector<1x8xf32>
    %348 = vector.broadcast %347 : vector<1x8xf32> to vector<8x8xf32>
    %349 = arith.mulf %346, %348 : vector<8x8xf32>
    %350 = vector.shape_cast %328 : vector<8xf32> to vector<1x8xf32>
    %351 = vector.broadcast %350 : vector<1x8xf32> to vector<8x8xf32>
    %352 = arith.addf %349, %351 : vector<8x8xf32>
    %c0_242 = arith.constant 0 : index
    %c0_243 = arith.constant 0 : index
    %353 = vector.load %arg8[%c0_242, %c0_243] : memref<8x16xf32, #tpu.memory_space<vmem>>, vector<8x16xf32>
    %cst_244 = arith.constant dense<0.000000e+00> : vector<8x16xf32>
    %354 = tpu.matmul %352, %353, %cst_244 {dimension_numbers = #tpu.dot_dimension_numbers<[1], [0], [0], [1], [0, 0, 1, 1], [], []>} : vector<8x8xf32>, vector<8x16xf32>, vector<8x16xf32> -> vector<8x16xf32>
    %c0_245 = arith.constant 0 : index
    %c0_246 = arith.constant 0 : index
    %355 = vector.load %arg9[%c0_245, %c0_246] : memref<1x16xf32, #tpu.memory_space<vmem>>, vector<1x16xf32>
    %356 = vector.broadcast %355 : vector<1x16xf32> to vector<8x16xf32>
    %357 = arith.addf %354, %356 : vector<8x16xf32>
    %c0_247 = arith.constant 0 : index
    %c0_248 = arith.constant 0 : index
    %358 = vector.load %arg10[%c0_247, %c0_248] : memref<8x16xf32, #tpu.memory_space<vmem>>, vector<8x16xf32>
    tpu.vector_store %arg10[%c0_247, %c0_248], %357 {strides = array<i32>} : memref<8x16xf32, #tpu.memory_space<vmem>>, vector<8x16xf32>,
    return
  }
  func.func @transform_0(%arg0: i32) -> (i32, i32) {
    %c0_i32 = arith.constant 0 : i32
    %c0_i32_0 = arith.constant 0 : i32
    %c0_i32_1 = arith.constant 0 : i32
    return %c0_i32, %c0_i32_0 : i32, i32
  }
  func.func @transform_1(%arg0: i32) -> i32 {
    %c0_i32 = arith.constant 0 : i32
    %c0_i32_0 = arith.constant 0 : i32
    return %c0_i32 : i32
  }
  func.func @transform_2(%arg0: i32) -> (i32, i32) {
    %c0_i32 = arith.constant 0 : i32
    %c0_i32_0 = arith.constant 0 : i32
    %c0_i32_1 = arith.constant 0 : i32
    return %c0_i32, %c0_i32_0 : i32, i32
  }
  func.func @transform_3(%arg0: i32) -> (i32, i32, i32) {
    %c0_i32 = arith.constant 0 : i32
    %c0_i32_0 = arith.constant 0 : i32
    %c0_i32_1 = arith.constant 0 : i32
    %c0_i32_2 = arith.constant 0 : i32
    return %c0_i32, %c0_i32_0, %c0_i32_1 : i32, i32, i32
  }
  func.func @transform_4(%arg0: i32) -> (i32, i32) {
    %c0_i32 = arith.constant 0 : i32
    %c0_i32_0 = arith.constant 0 : i32
    %c0_i32_1 = arith.constant 0 : i32
    return %c0_i32, %c0_i32_0 : i32, i32
  }
  func.func @transform_5(%arg0: i32) -> (i32, i32) {
    %c0_i32 = arith.constant 0 : i32
    %c0_i32_0 = arith.constant 0 : i32
    %c0_i32_1 = arith.constant 0 : i32
    return %c0_i32, %c0_i32_0 : i32, i32
  }
  func.func @transform_6(%arg0: i32) -> (i32, i32) {
    %c0_i32 = arith.constant 0 : i32
    %c0_i32_0 = arith.constant 0 : i32
    %c0_i32_1 = arith.constant 0 : i32
    return %c0_i32, %c0_i32_0 : i32, i32
  }
  func.func @transform_7(%arg0: i32) -> (i32, i32) {
    %c0_i32 = arith.constant 0 : i32
    %c0_i32_0 = arith.constant 0 : i32
    %c0_i32_1 = arith.constant 0 : i32
    return %c0_i32, %c0_i32_0 : i32, i32
  }
  func.func @transform_8(%arg0: i32) -> (i32, i32) {
    %c0_i32 = arith.constant 0 : i32
    %c0_i32_0 = arith.constant 0 : i32
    %c0_i32_1 = arith.constant 0 : i32
    return %c0_i32, %c0_i32_0 : i32, i32
  }
  func.func @transform_9(%arg0: i32) -> (i32, i32) {
    %c0_i32 = arith.constant 0 : i32
    %c0_i32_0 = arith.constant 0 : i32
    %c0_i32_1 = arith.constant 0 : i32
    return %c0_i32, %c0_i32_0 : i32, i32
  }
}

</mosaic_0001>

<bundles_post_ra>
// kernel: tpu_custom_call.1
= control target key start
LH: loop header
LB: loop body
LE: loop exit
PB: predicated region body
PF: predicated region fallthrough
CT: control target
= control target key end

     0   :  { %14 = vsyncpa [#allocation9], 0  ;;  %s2676_s0 = inlined_call_operand.vmem [shape: f32[128,1], index: 0, kind: input, shape index: {}]   ;;  %s2677_s1 = inlined_call_operand.vmem [shape: f32[6], index: 1, kind: input, shape index: {}]   ;;  %s2678_s2 = inlined_call_operand.vmem [shape: f32[4,8], index: 2, kind: input, shape index: {}]   ;;  %s2679_s3 = inlined_call_operand.vmem [shape: f32[3,32,8], index: 3, kind: input, shape index: {}]   ;;  %s2680_s4 = inlined_call_operand.vmem [shape: f32[4,8], index: 4, kind: input, shape index: {}]   ;;  %s2681_s5 = inlined_call_operand.vmem [shape: f32[4,8], index: 5, kind: input, shape index: {}]   ;;  %s2682_s6 = inlined_call_operand.vmem [shape: f32[4,8], index: 6, kind: input, shape index: {}]   ;;  %s2683_s7 = inlined_call_operand.vmem [shape: f32[8,16], index: 7, kind: input, shape index: {}]   ;;  %s2684_s8 = inlined_call_operand.vmem [shape: f32[1,16], index: 8, kind: input, shape index: {}]   ;;  %s2685_s9 = inlined_call_operand.hbm [shape: f32[8,16], index: 9, kind: output, shape index: {}]  }
   0x1   :  { %15 = vsyncpa [#allocation8], 0  ;;  %s23_s11 = sshll.u32 %s2677_s1, 4  ;;  %s1670_s12 = smov [#allocation7]   ;;  %s24_s11 = int_to_ptr.vmem [resolvable:$true] %s23_s11 }
   0x2   :  { %26 = dma.vmem_to_smem %s24_s11, 16, %s1670_s12, [#allocation9]  }
   0x3   :  { %1666 = dma.done.wait [#allocation9], 16  }
   0x4   :  { %1667 = vsyncadd [#allocation9], 4294967280 }
   0x5   :  { %45 = sfence }
   0x6   :  { %s1731_s13 = sld [smem:[#allocation7]]  ;;  %v51_v0 = vld [vmem:[%s2676_s0 + $0x18] sm:$0xff]  ;;  %v52_v1 = vld [vmem:[%s2676_s0 + $0x20] sm:$0xff]  ;;  %v53_v2 = vld [vmem:[%s2676_s0 + $0x28] sm:$0xff]  ;;  %v1671_v3 = vmov 0   ;;  %vm354_vm0 = vcmask 0  }
   0x7   :  { %1548 = vset.pattern.permute.xlu2 %v1671_v3  ;;  %1547 = vset.pattern.permute.xlu1 %v1671_v3  ;;  %s1742_s1 = sld [smem:[#allocation7 + $0x1]]  ;;  %v1744_v4 = vsub.f32 %v51_v0, %v51_v0  ;;  %v1746_v5 = vsub.f32 %v52_v1, %v52_v1  ;;  %v1748_v6 = vsub.f32 %v53_v2, %v53_v2  ;;  %v48_v7 = vld [vmem:[%s2676_s0] sm:$0xff]  ;;  %v49_v8 = vld [vmem:[%s2676_s0 + $0x8] sm:$0xff]  ;;  %v50_v9 = vld [vmem:[%s2676_s0 + $0x10] sm:$0xff]  ;;  %v1672_v16 = vmov 0.0   ;;  %s1674_s16 = smov 24  }
   0x8   :  { %1546 = vset.pattern.permute.xlu0 %v1671_v3  ;;  %v1759_v10 = vsub.f32 %v48_v7, %v48_v7  ;;  %v1761_v11 = vsub.f32 %v49_v8, %v49_v8  ;;  %v54_v12 = vld [vmem:[%s2676_s0 + $0x30] sm:$0xff]  ;;  %355 = vst.msk [vmem:[#allocation2] sm:$0x1] %vm354_vm0, %v1672_v16  ;;  %v1774_v17 = vsub.f32 %v50_v9, %v50_v9  ;;  %v55_v21 = vld [vmem:[%s2676_s0 + $0x38] sm:$0xff]  ;;  %v60_v36 = vld [vmem:[%s2676_s0 + $0x60] sm:$0xff]  ;;  %vm357_vm13 = vcmask 7168  }
   0x9   :  { %v99_v13 = vmul.f32 %v1744_v4, %v1744_v4  ;;  %v100_v14 = vmul.f32 %v1746_v5, %v1746_v5  ;;  %v101_v15 = vmul.f32 %v1748_v6, %v1748_v6  ;;  %356 = vst.msk [vmem:[#allocation2 + $0x41] sm:$0x1] %vm354_vm0, %v1672_v16  ;;  %v1782_v20 = vsub.f32 %v54_v12, %v54_v12  ;;  %v59_v35 = vld [vmem:[%s2676_s0 + $0x58] sm:$0xff]  ;;  %v61_v37 = vld [vmem:[%s2676_s0 + $0x68] sm:$0xff]  ;;  %s1510_s29 = sld [smem:[#allocation7 + $0x2]]  ;;  %s1675_s17 = smov 16  }
   0xa   :  { %v96_v18 = vmul.f32 %v1759_v10, %v1759_v10  ;;  %v97_v19 = vmul.f32 %v1761_v11, %v1761_v11  ;;  %v98_v25 = vmul.f32 %v1774_v17, %v1774_v17  ;;  %366 = vst.msk [vmem:[#allocation2 + $0x42] sm:$0x1] %vm354_vm0, %v1672_v16  ;;  %v1812_v31 = vsub.f32 %v55_v21, %v55_v21  ;;  %s1676_s18 = smov 8   ;;  %s1515_s25 = sld [smem:[#allocation7 + $0x3]] }
   0xb   :  { %v1787_v22 = vadd.f32 1e-05, %v99_v13  ;;  %v1789_v23 = vadd.f32 1e-05, %v100_v14  ;;  %v1791_v24 = vadd.f32 1e-05, %v101_v15  ;;  %v102_v28 = vmul.f32 %v1782_v20, %v1782_v20 }
   0xc   :  { %v1795_v26 = vadd.f32 1e-05, %v96_v18  ;;  %v1797_v27 = vadd.f32 1e-05, %v97_v19  ;;  %367 = vst.msk [vmem:[#allocation2 + $0x83] sm:$0x1] %vm354_vm0, %v1672_v16  ;;  %v1817_v32 = vstv %s1731_s13  ;;  %v103_v33 = vmul.f32 %v1812_v31, %v1812_v31 }
   0xd   :  { %1566 = vrsqrt.f32 %v1787_v22  ;;  %v1808_v29 = vadd.f32 1e-05, %v98_v25  ;;  %v1810_v30 = vadd.f32 1e-05, %v102_v28  ;;  %vm180_vm1 = vweird.f32 %v1787_v22  ;;  %v56_v25 = vld [vmem:[%s2676_s0 + $0x40] sm:$0xff]  ;;  %s1522_s20 = sld [smem:[#allocation7 + $0x4]] }
   0xe   :  { %1568 = vrsqrt.f32 %v1789_v23  ;;  %vm190_vm2 = vweird.f32 %v1789_v23  ;;  %vm200_vm3 = vweird.f32 %v1791_v24  ;;  %v1825_v34 = vstv %s1742_s1  ;;  %s1528_s10 = sld [smem:[#allocation7 + $0x5]]  ;;  %s1677_s1 = smov [#allocation10]  }
   0xf   :  { %1570 = vrsqrt.f32 %v1791_v24  ;;  %vm150_vm4 = vweird.f32 %v1795_v26  ;;  %v1841_v39 = vadd.f32 1e-05, %v103_v33  ;;  %v1843_v40 = vsub.f32 %v59_v35, %v59_v35 }
  0x10   :  { %1572 = vrsqrt.f32 %v1795_v26  ;;  %v1845_v41 = vsub.f32 %v60_v36, %v60_v36  ;;  %vm160_vm6 = vweird.f32 %v1797_v27  ;;  %v1853_v44 = vsub.f32 %v61_v37, %v61_v37 }
  0x11   :  { %1574 = vrsqrt.f32 %v1797_v27  ;;  %vm170_vm8 = vweird.f32 %v1808_v29  ;;  %v1864_v47 = vmul.f32 %v1843_v40, %v1843_v40  ;;  %vm210_vm15 = vweird.f32 %v1810_v30 }
  0x12   :  { %1576 = vrsqrt.f32 %v1808_v29  ;;  %v1874_v51 = vmul.f32 %v1845_v41, %v1845_v41  ;;  %v1884_v55 = vmul.f32 %v1853_v44, %v1853_v44 }
  0x13   :  { %v1837_v38 = vpop.eup %1566  ;;  %1578 = vrsqrt.f32 %v1810_v30  ;;  %v2026_v15 = vadd.f32 1e-05, %v1864_v47 }
  0x14   :  { %v1847_v42 = vpop.eup %1568  ;;  %v175_v43 = vmul.f32 %v1837_v38, %v1787_v22  ;;  %vm181_vm5 = vweird.f32 %v1837_v38  ;;  %1580 = vrsqrt.f32 %v1841_v39 }
  0x15   :  { %v1855_v45 = vpop.eup %1570  ;;  %v185_v46 = vmul.f32 %v1847_v42, %v1789_v23  ;;  %vm191_vm7 = vweird.f32 %v1847_v42  ;;  %vm1907_vm14 = vmor %vm180_vm1, %vm181_vm5  ;;  %1582 = vrsqrt.f32 %v2026_v15 }
  0x16   :  { %v1866_v48 = vpop.eup %1572  ;;  %v176_v49 = vmul.f32 %v1837_v38, %v175_v43  ;;  %v195_v50 = vmul.f32 %v1855_v45, %v1791_v24  ;;  %vm201_vm9 = vweird.f32 %v1855_v45  ;;  %vm1918_vm0 = vmor %vm190_vm2, %vm191_vm7  ;;  %vm220_vm7 = vweird.f32 %v1841_v39 }
  0x17   :  { %v1876_v52 = vpop.eup %1574  ;;  %v186_v53 = vmul.f32 %v1847_v42, %v185_v46  ;;  %v145_v54 = vmul.f32 %v1866_v48, %v1795_v26  ;;  %vm151_vm10 = vweird.f32 %v1866_v48  ;;  %vm1928_vm1 = vmor %vm200_vm3, %vm201_vm9  ;;  %v2059_v24 = vsub.f32 %v56_v25, %v56_v25 }
  0x18   :  { %v1886_v56 = vpop.eup %1576  ;;  %v177_v57 = vmul.f32 0.5, %v176_v49  ;;  %v196_v58 = vmul.f32 %v1855_v45, %v195_v50  ;;  %v155_v59 = vmul.f32 %v1876_v52, %v1797_v27  ;;  %vm161_vm11 = vweird.f32 %v1876_v52  ;;  %vm1941_vm5 = vmor %vm150_vm4, %vm151_vm10 }
  0x19   :  { %v1892_v60 = vpop.eup %1578  ;;  %v187_v61 = vmul.f32 0.5, %v186_v53  ;;  %v146_v62 = vmul.f32 %v1866_v48, %v145_v54  ;;  %v165_v63 = vmul.f32 %v1886_v56, %v1808_v29  ;;  %vm171_vm12 = vweird.f32 %v1886_v56  ;;  %vm1954_vm3 = vmor %vm160_vm6, %vm161_vm11 }
  0x1a   :  { %v178_v0 = vsub.f32 1.5, %v177_v57  ;;  %v197_v1 = vmul.f32 0.5, %v196_v58  ;;  %v156_v2 = vmul.f32 %v1876_v52, %v155_v59  ;;  %v205_v3 = vmul.f32 %v1892_v60, %v1810_v30  ;;  %v1901_v7 = vpop.eup %1580  ;;  %vm1967_vm4 = vmor %vm170_vm8, %vm171_vm12 }
  0x1b   :  { %v188_v9 = vsub.f32 1.5, %v187_v61  ;;  %v147_v12 = vmul.f32 0.5, %v146_v62  ;;  %v166_v13 = vmul.f32 %v1886_v56, %v165_v63  ;;  %vm211_vm2 = vweird.f32 %v1892_v60 }
  0x1c   :  { %v179_v14 = vmul.f32 %v1837_v38, %v178_v0  ;;  %v198_v18 = vsub.f32 1.5, %v197_v1  ;;  %v157_v19 = vmul.f32 0.5, %v156_v2  ;;  %v206_v21 = vmul.f32 %v1892_v60, %v205_v3  ;;  %vm1981_vm6 = vmor %vm210_vm15, %vm211_vm2  ;;  %v57_v0 = vld [vmem:[%s2676_s0 + $0x48] sm:$0xff] }
  0x1d   :  { %v189_v22 = vmul.f32 %v1847_v42, %v188_v9  ;;  %v148_v28 = vsub.f32 1.5, %v147_v12  ;;  %v167_v23 = vmul.f32 0.5, %v166_v13  ;;  %v215_v8 = vmul.f32 %v1901_v7, %v1841_v39  ;;  %v58_v9 = vld [vmem:[%s2676_s0 + $0x50] sm:$0xff]  ;;  %v2079_v39 = vpop.eup %1582 }
  0x1e   :  { %v183_v33 = vsel %vm1907_vm14, %v1837_v38, %v179_v14  ;;  %v199_v35 = vmul.f32 %v1855_v45, %v198_v18  ;;  %v158_v36 = vsub.f32 1.5, %v157_v19  ;;  %v207_v37 = vmul.f32 0.5, %v206_v21 }
  0x1f   :  { %v193_v43 = vsel %vm1918_vm0, %v1847_v42, %v189_v22  ;;  %v307_v46 = vmul.f32 %v183_v33, %v1744_v4  ;;  %v149_v38 = vmul.f32 %v1866_v48, %v148_v28  ;;  %v168_v49 = vsub.f32 1.5, %v167_v23  ;;  %v63_v23 = vld [vmem:[%s2676_s0 + $0x78] sm:$0xff] }
  0x20   :  { %v203_v50 = vsel %vm1928_vm1, %v1855_v45, %v199_v35  ;;  %v308_v53 = vmul.f32 %v193_v43, %v1746_v5  ;;  %v159_v42 = vmul.f32 %v1876_v52, %v158_v36  ;;  %v208_v27 = vsub.f32 1.5, %v207_v37 }
  0x21   :  { %v309_v54 = vmul.f32 %v203_v50, %v1748_v6  ;;  %v324_v57 = vmul.f32 %v1817_v32, %v307_v46  ;;  %v153_v45 = vsel %vm1941_vm5, %v1866_v48, %v149_v38  ;;  %v169_v5 = vmul.f32 %v1886_v56, %v168_v49 }
  0x22   :  { %v325_v58 = vmul.f32 %v1817_v32, %v308_v53  ;;  %v163_v6 = vsel %vm1954_vm3, %v1876_v52, %v159_v42  ;;  %v304_v59 = vmul.f32 %v153_v45, %v1759_v10  ;;  %v209_v48 = vmul.f32 %v1892_v60, %v208_v27 }
  0x23   :  { %v326_v61 = vmul.f32 %v1817_v32, %v309_v54  ;;  %v341_v62 = vadd.f32 %v1825_v34, %v324_v57  ;;  %v305_v30 = vmul.f32 %v163_v6, %v1761_v11  ;;  %v173_v63 = vsel %vm1967_vm4, %v1886_v56, %v169_v5 }
  0x24   :  { %v342_v52 = vadd.f32 %v1825_v34, %v325_v58  ;;  %v321_v10 = vmul.f32 %v1817_v32, %v304_v59  ;;  %v306_v1 = vmul.f32 %v173_v63, %v1774_v17  ;;  %v213_v2 = vsel %vm1981_vm6, %v1892_v60, %v209_v48 }
  0x25   :  { %v343_v11 = vadd.f32 %v1825_v34, %v326_v61  ;;  %361 = vst.msk [vmem:[#allocation2 + $0x19] sm:$0xff] %vm357_vm13, %v341_v62  ;;  %v322_v56 = vmul.f32 %v1817_v32, %v305_v30  ;;  %v310_v3 = vmul.f32 %v213_v2, %v1782_v20  ;;  %v2019_v12 = vsub.f32 %v57_v0, %v57_v0 }
  0x26   :  { %362 = vst.msk [vmem:[#allocation2 + $0x21] sm:$0xff] %vm357_vm13, %v342_v52  ;;  %v338_v17 = vadd.f32 %v1825_v34, %v321_v10  ;;  %v323_v60 = vmul.f32 %v1817_v32, %v306_v1  ;;  %v216_v14 = vmul.f32 %v1901_v7, %v215_v8  ;;  %v2031_v19 = vadd.f32 1e-05, %v1874_v51  ;;  %v62_v51 = vld [vmem:[%s2676_s0 + $0x70] sm:$0xff] }
  0x27   :  { %363 = vst.msk [vmem:[#allocation2 + $0x29] sm:$0xff] %vm357_vm13, %v343_v11  ;;  %v339_v20 = vadd.f32 %v1825_v34, %v322_v56  ;;  %v327_v13 = vmul.f32 %v1817_v32, %v310_v3  ;;  %v2034_v21 = vadd.f32 1e-05, %v1884_v55  ;;  %v2036_v22 = vsub.f32 %v58_v9, %v58_v9 }
  0x28   :  { %358 = vst.msk [vmem:[#allocation2 + $0x1] sm:$0xff] %vm357_vm13, %v338_v17  ;;  %v340_v18 = vadd.f32 %v1825_v34, %v323_v60  ;;  %v217_v28 = vmul.f32 0.5, %v216_v14  ;;  %vm221_vm8 = vweird.f32 %v1901_v7  ;;  %1584 = vrsqrt.f32 %v2031_v19 }
  0x29   :  { %359 = vst.msk [vmem:[#allocation2 + $0x9] sm:$0xff] %vm357_vm13, %v339_v20  ;;  %v344_v47 = vadd.f32 %v1825_v34, %v327_v13  ;;  %v105_v55 = vmul.f32 %v2019_v12, %v2019_v12  ;;  %1586 = vrsqrt.f32 %v2034_v21  ;;  %v106_v35 = vmul.f32 %v2036_v22, %v2036_v22  ;;  %vm2063_vm9 = vmor %vm220_vm7, %vm221_vm8 }
  0x2a   :  { %360 = vst.msk [vmem:[#allocation2 + $0x11] sm:$0xff] %vm357_vm13, %v340_v18  ;;  %v218_v33 = vsub.f32 1.5, %v217_v28  ;;  %v2069_v43 = vsub.f32 %v62_v51, %v62_v51  ;;  %v104_v26 = vmul.f32 %v2059_v24, %v2059_v24  ;;  %v2076_v49 = vsub.f32 %v63_v23, %v63_v23 }
  0x2b   :  { %364 = vst.msk [vmem:[#allocation2 + $0x31] sm:$0xff] %vm357_vm13, %v344_v47  ;;  %v2067_v37 = vadd.f32 1e-05, %v105_v55  ;;  %v2072_v38 = vadd.f32 1e-05, %v106_v35  ;;  %v255_v5 = vmul.f32 %v2079_v39, %v2026_v15  ;;  %vm260_vm10 = vweird.f32 %v2026_v15 }
  0x2c   :  { %v219_v46 = vmul.f32 %v1901_v7, %v218_v33  ;;  %v2085_v42 = vadd.f32 1e-05, %v104_v26  ;;  %v110_v4 = vmul.f32 %v2069_v43, %v2069_v43  ;;  %vm270_vm11 = vweird.f32 %v2031_v19 }
  0x2d   :  { %1588 = vrsqrt.f32 %v2067_v37  ;;  %vm280_vm12 = vweird.f32 %v2034_v21  ;;  %v256_v6 = vmul.f32 %v2079_v39, %v255_v5  ;;  %vm240_vm14 = vweird.f32 %v2067_v37 }
  0x2e   :  { %v380_v50 = vld [vmem:[#allocation2 + $0x20] ss:$2 sm:$0xff]  ;;  %v223_v53 = vsel %vm2063_vm9, %v1901_v7, %v219_v46  ;;  %1590 = vrsqrt.f32 %v2072_v38  ;;  %v2089_v27 = vpop.eup %1584  ;;  %vm261_vm15 = vweird.f32 %v2079_v39  ;;  %vm250_vm0 = vweird.f32 %v2072_v38  ;;  %v418_v30 = vld [vmem:[#allocation2 + $0x21] ss:$2 sm:$0xff] }
  0x2f   :  { %396 = vperm.xlu2 %1548, %v380_v50   ;;  %v311_v45 = vmul.f32 %v223_v53, %v1812_v31  ;;  %v2096_v7 = vpop.eup %1586  ;;  %v265_v29 = vmul.f32 %v2089_v27, %v2031_v19  ;;  %1592 = vrsqrt.f32 %v2085_v42  ;;  %v111_v31 = vmul.f32 %v2076_v49, %v2076_v49  ;;  %vm2136_vm5 = vmor %vm260_vm10, %vm261_vm15  ;;  %v456_v53 = vld [vmem:[#allocation2 + $0x22] ss:$2 sm:$0xff] }
  0x30   :  { %v414_v54 = vld [vmem:[#allocation2 + $0x1] ss:$2 sm:$0xff]  ;;  %v376_v57 = vld [vmem:[#allocation2] ss:$2 sm:$0xff]  ;;  %v275_v59 = vmul.f32 %v2096_v7, %v2034_v21  ;;  %v2112_v61 = vadd.f32 1e-05, %v110_v4  ;;  %vm271_vm1 = vweird.f32 %v2089_v27  ;;  %vm281_vm2 = vweird.f32 %v2096_v7 }
  0x31   :  { %424 = vperm.xlu1 %1547, %v414_v54   ;;  %386 = vperm.xlu0 %1546, %v376_v57   ;;  %v328_v58 = vmul.f32 %v1817_v32, %v311_v45  ;;  %v266_v48 = vmul.f32 %v2089_v27, %v265_v29  ;;  %v257_v0 = vmul.f32 0.5, %v256_v6  ;;  %v416_v1 = vld [vmem:[#allocation2 + $0x11] ss:$2 sm:$0xff]  ;;  %v2123_v56 = vadd.f32 1e-05, %v111_v31  ;;  %vm2148_vm6 = vmor %vm270_vm11, %vm271_vm1 }
  0x32   :  { %v276_v52 = vmul.f32 %v2096_v7, %v275_v59  ;;  %1594 = vrsqrt.f32 %v2112_v61  ;;  %v378_v3 = vld [vmem:[#allocation2 + $0x10] ss:$2 sm:$0xff]  ;;  %vm230_vm4 = vweird.f32 %v2085_v42  ;;  %vm2160_vm7 = vmor %vm280_vm12, %vm281_vm2  ;;  %vm290_vm12 = vweird.f32 %v2112_v61 }
  0x33   :  { %v2114_v62 = vpop.eup %1588  ;;  %v345_v63 = vadd.f32 %v1825_v34, %v328_v58  ;;  %v267_v2 = vmul.f32 0.5, %v266_v48  ;;  %v258_v8 = vsub.f32 1.5, %v257_v0  ;;  %1596 = vrsqrt.f32 %v2123_v56  ;;  %v452_v29 = vld [vmem:[#allocation2 + $0x2] ss:$2 sm:$0xff] }
  0x34   :  { %v2119_v10 = vpop.eup %1590  ;;  %v235_v11 = vmul.f32 %v2114_v62, %v2067_v37  ;;  %v277_v9 = vmul.f32 0.5, %v276_v52  ;;  %vm241_vm3 = vweird.f32 %v2114_v62  ;;  %vm300_vm1 = vweird.f32 %v2123_v56 }
  0x35   :  { %365 = vst.msk [vmem:[#allocation2 + $0x39] sm:$0xff] %vm357_vm13, %v345_v63  ;;  %v245_v17 = vmul.f32 %v2119_v10, %v2072_v38  ;;  %v2130_v60 = vpop.eup %1592  ;;  %v268_v13 = vsub.f32 1.5, %v267_v2  ;;  %v259_v18 = vmul.f32 %v2079_v39, %v258_v8  ;;  %vm251_vm8 = vweird.f32 %v2119_v10  ;;  %vm2186_vm10 = vmor %vm240_vm14, %vm241_vm3 }
  0x36   :  { %v236_v14 = vmul.f32 %v2114_v62, %v235_v11  ;;  %v278_v15 = vsub.f32 1.5, %v277_v9  ;;  %v225_v28 = vmul.f32 %v2130_v60, %v2085_v42  ;;  %vm231_vm9 = vweird.f32 %v2130_v60  ;;  %vm2197_vm11 = vmor %vm250_vm0, %vm251_vm8 }
  0x37   :  { %434 = vperm.xlu2 %1548, %v418_v30   ;;  %v246_v47 = vmul.f32 %v2119_v10, %v245_v17  ;;  %v269_v51 = vmul.f32 %v2089_v27, %v268_v13  ;;  %v263_v23 = vsel %vm2136_vm5, %v2079_v39, %v259_v18  ;;  %vm2215_vm14 = vmor %vm230_vm4, %vm231_vm9  ;;  %v494_v17 = vld [vmem:[#allocation2 + $0x23] ss:$2 sm:$0xff]  ;;  %vm709_vm3 = vcmask 64512  }
  0x38   :  { %v237_v55 = vmul.f32 0.5, %v236_v14  ;;  %v279_v33 = vmul.f32 %v2096_v7, %v278_v15  ;;  %v226_v36 = vmul.f32 %v2130_v60, %v225_v28  ;;  %v2171_v46 = vpop.eup %1594  ;;  %v315_v26 = vmul.f32 %v263_v23, %v1843_v40  ;;  %v492_v15 = vld [vmem:[#allocation2 + $0x13] ss:$2 sm:$0xff] }
  0x39   :  { %429 = vperm.xlu1 %1547, %v416_v1   ;;  %391 = vperm.xlu0 %1546, %v378_v3   ;;  %v247_v35 = vmul.f32 0.5, %v246_v47  ;;  %v273_v21 = vsel %vm2148_vm6, %v2089_v27, %v269_v51  ;;  %v285_v37 = vmul.f32 %v2171_v46, %v2112_v61  ;;  %v1597_v6 = vpop.eup %1596  ;;  %vm291_vm15 = vweird.f32 %v2171_v46  ;;  %v490_v47 = vld [vmem:[#allocation2 + $0x3] ss:$2 sm:$0xff] }
  0x3a   :  { %v238_v50 = vsub.f32 1.5, %v237_v55  ;;  %v283_v39 = vsel %vm2160_vm7, %v2096_v7, %v279_v33  ;;  %v316_v4 = vmul.f32 %v273_v21, %v1845_v41  ;;  %v227_v40 = vmul.f32 0.5, %v226_v36  ;;  %v454_v7 = vld [vmem:[#allocation2 + $0x12] ss:$2 sm:$0xff]  ;;  %vm2242_vm0 = vmor %vm290_vm12, %vm291_vm15 }
  0x3b   :  { %v248_v27 = vsub.f32 1.5, %v247_v35  ;;  %v317_v57 = vmul.f32 %v283_v39, %v1853_v44  ;;  %v332_v45 = vmul.f32 %v1817_v32, %v315_v26  ;;  %v286_v63 = vmul.f32 %v2171_v46, %v285_v37 }
  0x3c   :  { %v239_v5 = vmul.f32 %v2114_v62, %v238_v50  ;;  %v333_v31 = vmul.f32 %v1817_v32, %v316_v4  ;;  %v228_v58 = vsub.f32 1.5, %v227_v40  ;;  %vm301_vm2 = vweird.f32 %v1597_v6  ;;  %v458_v23 = vld [vmem:[#allocation2 + $0x32] ss:$2 sm:$0xff]  ;;  %v420_v21 = vld [vmem:[#allocation2 + $0x31] ss:$2 sm:$0xff] }
  0x3d   :  { %v249_v44 = vmul.f32 %v2119_v10, %v248_v27  ;;  %v334_v38 = vmul.f32 %v1817_v32, %v317_v57  ;;  %v349_v59 = vadd.f32 %v1825_v34, %v332_v45  ;;  %v287_v11 = vmul.f32 0.5, %v286_v63  ;;  %vm302_vm5 = vmor %vm300_vm1, %vm301_vm2  ;;  %v382_v26 = vld [vmem:[#allocation2 + $0x30] ss:$2 sm:$0xff]  ;;  %v496_v27 = vld [vmem:[#allocation2 + $0x33] ss:$2 sm:$0xff] }
  0x3e   :  { %v243_v48 = vsel %vm2186_vm10, %v2114_v62, %v239_v5  ;;  %v350_v0 = vadd.f32 %v1825_v34, %v333_v31  ;;  %v229_v62 = vmul.f32 %v2130_v60, %v228_v58  ;;  %v2268_v58 = vld [vmem:[%s2678_s2] ss:$0 sm:$0xff]  ;;  %vm911_vm1 = vcmask 57344  }
  0x3f   :  { %472 = vperm.xlu2 %1548, %v456_v53   ;;  %v253_v52 = vsel %vm2197_vm11, %v2119_v10, %v249_v44  ;;  %v313_v1 = vmul.f32 %v243_v48, %v2019_v12  ;;  %v351_v42 = vadd.f32 %v1825_v34, %v334_v38  ;;  %371 = vst.msk [vmem:[#allocation2 + $0x5b] sm:$0xff] %vm357_vm13, %v349_v59  ;;  %v2280_v48 = vld [vmem:[%s2678_s2 + $0x2] ss:$0 sm:$0xff] }
  0x40   :  { %v314_v2 = vmul.f32 %v253_v52, %v2036_v22  ;;  %372 = vst.msk [vmem:[#allocation2 + $0x63] sm:$0xff] %vm357_vm13, %v350_v0  ;;  %v233_v12 = vsel %vm2215_vm14, %v2130_v60, %v229_v62  ;;  %v295_v10 = vmul.f32 %v1597_v6, %v2123_v56  ;;  %v288_v22 = vsub.f32 1.5, %v287_v11  ;;  %v2286_v52 = vld [vmem:[%s2678_s2 + $0x3] ss:$0 sm:$0xff] }
  0x41   :  { %467 = vperm.xlu1 %1547, %v454_v7   ;;  %462 = vperm.xlu0 %1546, %v452_v29   ;;  %v330_v3 = vmul.f32 %v1817_v32, %v313_v1  ;;  %373 = vst.msk [vmem:[#allocation2 + $0x6b] sm:$0xff] %vm357_vm13, %v351_v42  ;;  %v312_v9 = vmul.f32 %v233_v12, %v2059_v24  ;;  %v2291_v42 = vld [vmem:[%s2680_s4] ss:$0 sm:$0xff] }
  0x42   :  { %v331_v8 = vmul.f32 %v1817_v32, %v314_v2  ;;  %v296_v14 = vmul.f32 %v1597_v6, %v295_v10  ;;  %v289_v25 = vmul.f32 %v2171_v46, %v288_v22  ;;  %v2294_v10 = vstv %s1510_s29  ;;  %913 = vst.msk [vmem:[#allocation3 + $0x21] sm:$0x1] %vm911_vm1, %v1672_v16 }
  0x43   :  { %v347_v20 = vadd.f32 %v1825_v34, %v330_v3  ;;  %v329_v18 = vmul.f32 %v1817_v32, %v312_v9  ;;  %912 = vst.msk [vmem:[#allocation3] sm:$0x1] %vm911_vm1, %v1672_v16 }
  0x44   :  { %v348_v60 = vadd.f32 %v1825_v34, %v331_v8  ;;  %v297_v24 = vmul.f32 0.5, %v296_v14  ;;  %v293_v28 = vsel %vm2242_vm0, %v2171_v46, %v289_v25  ;;  %918 = vst.msk [vmem:[#allocation3 + $0x22] sm:$0x1] %vm911_vm1, %v1672_v16 }
  0x45   :  { %369 = vst.msk [vmem:[#allocation2 + $0x4b] sm:$0xff] %vm357_vm13, %v347_v20  ;;  %v346_v61 = vadd.f32 %v1825_v34, %v329_v18  ;;  %v318_v19 = vmul.f32 %v293_v28, %v2069_v43 }
  0x46   :  { %370 = vst.msk [vmem:[#allocation2 + $0x53] sm:$0xff] %vm357_vm13, %v348_v60  ;;  %v298_v51 = vsub.f32 1.5, %v297_v24 }
  0x47   :  { %510 = vperm.xlu2 %1548, %v494_v17   ;;  %368 = vst.msk [vmem:[#allocation2 + $0x43] sm:$0xff] %vm357_vm13, %v346_v61  ;;  %v335_v56 = vmul.f32 %v1817_v32, %v318_v19 }
  0x48   :  { %v299_v55 = vmul.f32 %v1597_v6, %v298_v51  ;;  %v532_v50 = vld [vmem:[#allocation2 + $0x62] ss:$2 sm:$0xff]  ;;  %v568_v40 = vld [vmem:[#allocation2 + $0x63] ss:$2 sm:$0xff]  ;;  %919 = vst.msk [vmem:[#allocation3 + $0x43] sm:$0x1] %vm911_vm1, %v1672_v16 }
  0x49   :  { %505 = vperm.xlu1 %1547, %v492_v15   ;;  %500 = vperm.xlu0 %1546, %v490_v47   ;;  %v352_v35 = vadd.f32 %v1825_v34, %v335_v56  ;;  %1188 = vst.msk [vmem:[#allocation4] sm:$0x1] %vm911_vm1, %v1672_v16 }
  0x4a   :  { %v303_v33 = vsel %vm302_vm5, %v1597_v6, %v299_v55  ;;  %v2273_v6 = vld [vmem:[%s2678_s2 + $0x1] ss:$0 sm:$0xff]  ;;  %1189 = vst.msk [vmem:[#allocation4 + $0x11] sm:$0x1] %vm911_vm1, %v1672_v16 }
  0x4b   :  { %v319_v36 = vmul.f32 %v303_v33, %v2076_v49  ;;  %374 = vst.msk [vmem:[#allocation2 + $0x73] sm:$0xff] %vm357_vm13, %v352_v35 }
  0x4c   :  { %1192 = vst.msk [vmem:[#allocation4 + $0x12] sm:$0x1] %vm911_vm1, %v1672_v16 }
  0x4d   :  { %v336_v43 = vmul.f32 %v1817_v32, %v319_v36  ;;  %v530_v53 = vld [vmem:[#allocation2 + $0x52] ss:$2 sm:$0xff]  ;;  %v566_v49 = vld [vmem:[#allocation2 + $0x53] ss:$2 sm:$0xff]  ;;  %1193 = vst.msk [vmem:[#allocation4 + $0x23] sm:$0x1] %vm911_vm1, %v1672_v16 }
  0x4e   :  { %v528_v39 = vld [vmem:[#allocation2 + $0x42] ss:$2 sm:$0xff]  ;;  %v564_v4 = vld [vmem:[#allocation2 + $0x43] ss:$2 sm:$0xff]  ;;  %1341 = vst.msk [vmem:[#allocation5] sm:$0x1] %vm911_vm1, %v1672_v16 }
  0x4f   :  { %477 = vperm.xlu2 %1548, %v458_v23   ;;  %v353_v46 = vadd.f32 %v1825_v34, %v336_v43  ;;  %v604_v34 = vld [vmem:[#allocation2 + $0x64] ss:$2 sm:$0xff]  ;;  %v602_v57 = vld [vmem:[#allocation2 + $0x54] ss:$2 sm:$0xff]  ;;  %v638_v5 = vld [vmem:[#allocation2 + $0x55] ss:$2 sm:$0xff] }
  0x50   :  { %v600_v45 = vld [vmem:[#allocation2 + $0x44] ss:$2 sm:$0xff]  ;;  %v636_v41 = vld [vmem:[#allocation2 + $0x45] ss:$2 sm:$0xff]  ;;  %1342 = vst.msk [vmem:[#allocation5 + $0x9] sm:$0x1] %vm911_vm1, %v1672_v16 }
  0x51   :  { %439 = vperm.xlu1 %1547, %v420_v21   ;;  %401 = vperm.xlu0 %1546, %v382_v26   ;;  %375 = vst.msk [vmem:[#allocation2 + $0x7b] sm:$0xff] %vm357_vm13, %v353_v46 }
  0x52   :  { %v640_v29 = vld [vmem:[#allocation2 + $0x65] ss:$2 sm:$0xff]  ;;  %1344 = vst.msk [vmem:[#allocation5 + $0xa] sm:$0x1] %vm911_vm1, %v1672_v16 }
  0x53   :  { %1345 = vst.msk [vmem:[#allocation5 + $0x13] sm:$0x1] %vm911_vm1, %v1672_v16 }
  0x57   :  { %547 = vperm.xlu2 %1548, %v532_v50  }
  0x58   :  { %v534_v54 = vld [vmem:[#allocation2 + $0x72] ss:$2 sm:$0xff]  ;;  %v570_v32 = vld [vmem:[#allocation2 + $0x73] ss:$2 sm:$0xff] }
  0x59   :  { %542 = vperm.xlu1 %1547, %v530_v53   ;;  %537 = vperm.xlu0 %1546, %v528_v39   ;;  %v606_v37 = vld [vmem:[#allocation2 + $0x74] ss:$2 sm:$0xff]  ;;  %v642_v7 = vld [vmem:[#allocation2 + $0x75] ss:$2 sm:$0xff] }
  0x5f   :  { %578 = vperm.xlu2 %1548, %v566_v49  }
  0x61   :  { %573 = vperm.xlu1 %1547, %v564_v4   ;;  %552 = vperm.xlu0 %1546, %v534_v54  }
  0x67   :  { %515 = vperm.xlu2 %1548, %v496_v27  }
  0x69   :  { %588 = vperm.xlu1 %1547, %v570_v32   ;;  %583 = vperm.xlu0 %1546, %v568_v40  }
  0x6f   :  { %619 = vperm.xlu2 %1548, %v604_v34  }
  0x71   :  { %614 = vperm.xlu1 %1547, %v602_v57   ;;  %609 = vperm.xlu0 %1546, %v600_v45  }
  0x77   :  { %650 = vperm.xlu2 %1548, %v638_v5  }
  0x79   :  { %645 = vperm.xlu1 %1547, %v636_v41   ;;  %624 = vperm.xlu0 %1546, %v606_v37  }
  0x81   :  { %660 = vperm.xlu1 %1547, %v642_v7   ;;  %655 = vperm.xlu0 %1546, %v640_v29  }
  0x89   :  { %v397_v31 = vpop.permute.xlu2 %396 }
  0x8a   :  { %v407_v38 = vmul.f32 %v2268_v58, %v397_v31 }
  0x91   :  { %v435_v44 = vpop.permute.xlu2 %434 }
  0x92   :  { %v445_v59 = vmul.f32 %v2273_v6, %v435_v44 }
  0x94   :  { %v449_v63 = vadd.f32 %v445_v59, %v407_v38 }
  0x99   :  { %v473_v30 = vpop.permute.xlu2 %472 }
  0x9a   :  { %v483_v0 = vmul.f32 %v2280_v48, %v473_v30 }
  0x9c   :  { %v487_v1 = vadd.f32 %v483_v0, %v449_v63 }
  0xa1   :  { %v511_v62 = vpop.permute.xlu2 %510 }
  0xa2   :  { %v521_v2 = vmul.f32 %v2286_v52, %v511_v62 }
  0xa3   :  { %v425_v11 = vpop.permute.xlu1 %424  ;;  %v387_v3 = vpop.permute.xlu0 %386 }
  0xa4   :  { %v525_v12 = vadd.f32 %v521_v2, %v487_v1  ;;  %v443_v15 = vmul.f32 %v2273_v6, %v425_v11  ;;  %v405_v47 = vmul.f32 %v2268_v58, %v387_v3 }
  0xa6   :  { %v675_v8 = vadd.f32 %v2291_v42, %v525_v12  ;;  %v447_v19 = vadd.f32 %v443_v15, %v405_v47 }
  0xa8   :  { %vm683_vm13 = vcmp.ge.f32.partialorder %v675_v8, 0.0  ;;  %v693_v9 = vmul.f32 %v2294_v10, %v675_v8 }
  0xa9   :  { %v478_v22 = vpop.permute.xlu2 %477 }
  0xaa   :  { %v2298_v17 = vsel %vm683_vm13, %v675_v8, %v693_v9  ;;  %v484_v5 = vmul.f32 %v2280_v48, %v478_v22 }
  0xab   :  { %v430_v20 = vpop.permute.xlu1 %429  ;;  %v392_v13 = vpop.permute.xlu0 %391  ;;  %v716_v14 = vsel %vm709_vm3, %v2298_v17, 0.0 }
  0xac   :  { %717 = vadd.xlane.f32.xlu1 %v716_v14  ;;  %v444_v24 = vmul.f32 %v2273_v6, %v430_v20  ;;  %v406_v61 = vmul.f32 %v2268_v58, %v392_v13 }
  0xae   :  { %v448_v55 = vadd.f32 %v444_v24, %v406_v61 }
  0xb1   :  { %v2302_v60 = vpop.permute.xlu2 %547 }
  0xb3   :  { %v468_v18 = vpop.permute.xlu1 %467  ;;  %v463_v25 = vpop.permute.xlu0 %462 }
  0xb4   :  { %v482_v28 = vmul.f32 %v2280_v48, %v468_v18  ;;  %v481_v51 = vmul.f32 %v2280_v48, %v463_v25 }
  0xb6   :  { %v486_v35 = vadd.f32 %v482_v28, %v448_v55  ;;  %v485_v36 = vadd.f32 %v481_v51, %v447_v19 }
  0xb9   :  { %v579_v56 = vpop.permute.xlu2 %578 }
  0xba   :  { %v592_v8 = vmul.f32 %v2273_v6, %v579_v56 }
  0xbb   :  { %v506_v23 = vpop.permute.xlu1 %505  ;;  %v501_v33 = vpop.permute.xlu0 %500 }
  0xbc   :  { %v520_v21 = vmul.f32 %v2286_v52, %v506_v23  ;;  %v519_v26 = vmul.f32 %v2286_v52, %v501_v33 }
  0xbe   :  { %v524_v43 = vadd.f32 %v520_v21, %v486_v35  ;;  %v523_v46 = vadd.f32 %v519_v26, %v485_v36  ;;  %v557_v36 = vmul.f32 %v2268_v58, %v2302_v60 }
  0xc0   :  { %v674_v50 = vadd.f32 %v2291_v42, %v524_v43  ;;  %v673_v53 = vadd.f32 %v2291_v42, %v523_v46 }
  0xc1   :  { %v516_v34 = vpop.permute.xlu2 %515 }
  0xc2   :  { %vm682_vm4 = vcmp.ge.f32.partialorder %v674_v50, 0.0  ;;  %v692_v39 = vmul.f32 %v2294_v10, %v674_v50  ;;  %vm681_vm6 = vcmp.ge.f32.partialorder %v673_v53, 0.0  ;;  %v691_v54 = vmul.f32 %v2294_v10, %v673_v53 }
  0xc3   :  { %v440_v49 = vpop.permute.xlu1 %439  ;;  %v402_v4 = vpop.permute.xlu0 %401  ;;  %v522_v7 = vmul.f32 %v2286_v52, %v516_v34 }
  0xc4   :  { %v446_v27 = vmul.f32 %v2273_v6, %v440_v49  ;;  %v408_v32 = vmul.f32 %v2268_v58, %v402_v4  ;;  %v2318_v40 = vsel %vm682_vm4, %v674_v50, %v692_v39  ;;  %v2322_v45 = vsel %vm681_vm6, %v673_v53, %v691_v54 }
  0xc5   :  { %v713_v57 = vsel %vm709_vm3, %v2318_v40, 0.0  ;;  %v710_v37 = vsel %vm709_vm3, %v2322_v45, 0.0 }
  0xc6   :  { %v450_v41 = vadd.f32 %v446_v27, %v408_v32  ;;  %714 = vadd.xlane.f32.xlu0 %v713_v57  ;;  %711 = vadd.xlane.f32.xlu2 %v710_v37 }
  0xc8   :  { %v488_v29 = vadd.f32 %v484_v5, %v450_v41 }
  0xc9   :  { %v620_v2 = vpop.permute.xlu2 %619 }
  0xca   :  { %v526_v31 = vadd.f32 %v522_v7, %v488_v29  ;;  %v629_v4 = vmul.f32 %v2280_v48, %v620_v2 }
  0xcb   :  { %v543_v44 = vpop.permute.xlu1 %542  ;;  %v538_v38 = vpop.permute.xlu0 %537 }
  0xcc   :  { %v676_v59 = vadd.f32 %v2291_v42, %v526_v31  ;;  %v556_v12 = vmul.f32 %v2268_v58, %v543_v44  ;;  %v555_v47 = vmul.f32 %v2268_v58, %v538_v38 }
  0xce   :  { %vm684_vm7 = vcmp.ge.f32.partialorder %v676_v59, 0.0  ;;  %v694_v30 = vmul.f32 %v2294_v10, %v676_v59  ;;  %v596_v13 = vadd.f32 %v592_v8, %v556_v12 }
  0xd0   :  { %v2330_v63 = vsel %vm684_vm7, %v676_v59, %v694_v30 }
  0xd1   :  { %v719_v0 = vsel %vm709_vm3, %v2330_v63, 0.0  ;;  %v651_v9 = vpop.permute.xlu2 %650 }
  0xd2   :  { %720 = vadd.xlane.f32.xlu2 %v719_v0  ;;  %v664_v18 = vmul.f32 %v2286_v52, %v651_v9  ;;  %v1673_v0 = vmov 8.0  }
  0xd3   :  { %v574_v1 = vpop.permute.xlu1 %573  ;;  %v553_v62 = vpop.permute.xlu0 %552  ;;  %1598 = vrcp.f32 %v1673_v0 }
  0xd4   :  { %v591_v25 = vmul.f32 %v2273_v6, %v574_v1  ;;  %v558_v53 = vmul.f32 %v2268_v58, %v553_v62 }
  0xd6   :  { %v595_v28 = vadd.f32 %v591_v25, %v555_v47 }
  0xd9   :  { %v1599_v1 = vpop.eup %1598 }
  0xda   :  { %v735_v62 = vmul.f32 8.0, %v1599_v1  ;;  %vm739_vm12 = vweird.f32 %v1599_v1 }
  0xdb   :  { %v589_v11 = vpop.permute.xlu1 %588  ;;  %v584_v3 = vpop.permute.xlu0 %583 }
  0xdc   :  { %v593_v19 = vmul.f32 %v2273_v6, %v584_v3  ;;  %v594_v21 = vmul.f32 %v2273_v6, %v589_v11  ;;  %v736_v2 = vsub.f32 1.0, %v735_v62 }
  0xde   :  { %v597_v46 = vadd.f32 %v593_v19, %v557_v36  ;;  %v598_v54 = vadd.f32 %v594_v21, %v558_v53 }
  0xe0   :  { %v633_v27 = vadd.f32 %v629_v4, %v597_v46 }
  0xe3   :  { %v615_v22 = vpop.permute.xlu1 %614  ;;  %v610_v20 = vpop.permute.xlu0 %609 }
  0xe4   :  { %v628_v14 = vmul.f32 %v2280_v48, %v615_v22  ;;  %v627_v61 = vmul.f32 %v2280_v48, %v610_v20 }
  0xe6   :  { %v632_v15 = vadd.f32 %v628_v14, %v596_v13  ;;  %v631_v23 = vadd.f32 %v627_v61, %v595_v28 }
  0xe8   :  { %v668_v24 = vadd.f32 %v664_v18, %v632_v15 }
  0xea   :  { %v678_v51 = vadd.f32 %v2291_v42, %v668_v24 }
  0xeb   :  { %v646_v55 = vpop.permute.xlu1 %645  ;;  %v625_v56 = vpop.permute.xlu0 %624 }
  0xec   :  { %v663_v33 = vmul.f32 %v2286_v52, %v646_v55  ;;  %vm686_vm8 = vcmp.ge.f32.partialorder %v678_v51, 0.0  ;;  %v696_v35 = vmul.f32 %v2294_v10, %v678_v51  ;;  %v630_v49 = vmul.f32 %v2280_v48, %v625_v56 }
  0xee   :  { %v667_v26 = vadd.f32 %v663_v33, %v631_v23  ;;  %v2348_v43 = vsel %vm686_vm8, %v678_v51, %v696_v35  ;;  %v634_v34 = vadd.f32 %v630_v49, %v598_v54 }
  0xef   :  { %v725_v50 = vsel %vm709_vm3, %v2348_v43, 0.0 }
  0xf0   :  { %v677_v39 = vadd.f32 %v2291_v42, %v667_v26  ;;  %726 = vadd.xlane.f32.xlu0 %v725_v50 }
  0xf2   :  { %vm685_vm9 = vcmp.ge.f32.partialorder %v677_v39, 0.0  ;;  %v695_v6 = vmul.f32 %v2294_v10, %v677_v39 }
  0xf3   :  { %v661_v60 = vpop.permute.xlu1 %660  ;;  %v656_v32 = vpop.permute.xlu0 %655 }
  0xf4   :  { %v666_v57 = vmul.f32 %v2286_v52, %v661_v60  ;;  %v665_v5 = vmul.f32 %v2286_v52, %v656_v32  ;;  %v703_v58 = vsel %vm685_vm9, %v677_v39, %v695_v6 }
  0xf5   :  { %v722_v41 = vsel %vm709_vm3, %v703_v58, 0.0 }
  0xf6   :  { %v670_v37 = vadd.f32 %v666_v57, %v634_v34  ;;  %v669_v7 = vadd.f32 %v665_v5, %v633_v27  ;;  %723 = vadd.xlane.f32.xlu2 %v722_v41 }
  0xf8   :  { %v680_v48 = vadd.f32 %v2291_v42, %v670_v37  ;;  %v679_v29 = vadd.f32 %v2291_v42, %v669_v7  ;;  %v737_v42 = vmul.f32 %v1599_v1, %v736_v2 }
  0xfa   :  { %vm688_vm10 = vcmp.ge.f32.partialorder %v680_v48, 0.0  ;;  %v698_v31 = vmul.f32 %v2294_v10, %v680_v48  ;;  %vm687_vm11 = vcmp.ge.f32.partialorder %v679_v29, 0.0  ;;  %v697_v44 = vmul.f32 %v2294_v10, %v679_v29 }
  0xfb   :  { %v738_v11 = vadd.f32 %v1599_v1, %v737_v42 }
  0xfc   :  { %v706_v38 = vsel %vm688_vm10, %v680_v48, %v698_v31  ;;  %v705_v59 = vsel %vm687_vm11, %v679_v29, %v697_v44  ;;  %v2421_v29 = vld [vmem:[%s2681_s5] ss:$0 sm:$0xff] }
  0xfd   :  { %v731_v52 = vsel %vm709_vm3, %v706_v38, 0.0  ;;  %v728_v30 = vsel %vm709_vm3, %v705_v59, 0.0  ;;  %v2366_v3 = vsel %vm739_vm12, %v1599_v1, %v738_v11  ;;  %v2426_v44 = vld [vmem:[%s2682_s6] ss:$0 sm:$0xff] }
  0xfe   :  { %732 = vadd.xlane.f32.xlu2 %v731_v52  ;;  %729 = vadd.xlane.f32.xlu1 %v728_v30 }
 0x11f   :  { %v718_v12 = vpop.xlane.xlu1 %717 }
 0x120   :  { %v743_v10 = vmul.f32 %v2366_v3, %v718_v12 }
 0x122   :  { %v751_v8 = vsub.f32 %v2298_v17, %v743_v10 }
 0x124   :  { %v759_v9 = vmul.f32 %v751_v8, %v751_v8 }
 0x126   :  { %v771_v22 = vsel %vm709_vm3, %v759_v9, 0.0 }
 0x127   :  { %772 = vadd.xlane.f32.xlu2 %v771_v22 }
 0x139   :  { %v715_v20 = vpop.xlane.xlu0 %714  ;;  %v712_v13 = vpop.xlane.xlu2 %711 }
 0x13a   :  { %v742_v14 = vmul.f32 %v2366_v3, %v715_v20  ;;  %v741_v18 = vmul.f32 %v2366_v3, %v712_v13 }
 0x13c   :  { %v2374_v25 = vsub.f32 %v2318_v40, %v742_v14  ;;  %v2377_v15 = vsub.f32 %v2322_v45, %v741_v18 }
 0x13e   :  { %v758_v47 = vmul.f32 %v2374_v25, %v2374_v25  ;;  %v757_v17 = vmul.f32 %v2377_v15, %v2377_v15 }
 0x140   :  { %v768_v24 = vsel %vm709_vm3, %v758_v47, 0.0  ;;  %v765_v61 = vsel %vm709_vm3, %v757_v17, 0.0 }
 0x141   :  { %769 = vadd.xlane.f32.xlu1 %v768_v24  ;;  %766 = vadd.xlane.f32.xlu0 %v765_v61 }
 0x145   :  { %v721_v28 = vpop.xlane.xlu2 %720 }
 0x146   :  { %v744_v51 = vmul.f32 %v2366_v3, %v721_v28 }
 0x148   :  { %v2387_v40 = vsub.f32 %v2330_v63, %v744_v51 }
 0x14a   :  { %v760_v45 = vmul.f32 %v2387_v40, %v2387_v40 }
 0x14c   :  { %v774_v19 = vsel %vm709_vm3, %v760_v45, 0.0 }
 0x14d   :  { %775 = vadd.xlane.f32.xlu0 %v774_v19 }
 0x163   :  { %v727_v55 = vpop.xlane.xlu0 %726 }
 0x164   :  { %v746_v56 = vmul.f32 %v2366_v3, %v727_v55 }
 0x166   :  { %v2394_v23 = vsub.f32 %v2348_v43, %v746_v56 }
 0x168   :  { %v762_v33 = vmul.f32 %v2394_v23, %v2394_v23 }
 0x169   :  { %v724_v35 = vpop.xlane.xlu2 %723 }
 0x16a   :  { %v745_v36 = vmul.f32 %v2366_v3, %v724_v35  ;;  %v780_v63 = vsel %vm709_vm3, %v762_v33, 0.0 }
 0x16b   :  { %781 = vadd.xlane.f32.xlu2 %v780_v63 }
 0x16c   :  { %v2400_v21 = vsub.f32 %v703_v58, %v745_v36 }
 0x16e   :  { %v761_v26 = vmul.f32 %v2400_v21, %v2400_v21 }
 0x170   :  { %v777_v46 = vsel %vm709_vm3, %v761_v26, 0.0 }
 0x171   :  { %v733_v50 = vpop.xlane.xlu2 %732  ;;  %v730_v53 = vpop.xlane.xlu1 %729  ;;  %778 = vadd.xlane.f32.xlu1 %v777_v46 }
 0x172   :  { %v748_v43 = vmul.f32 %v2366_v3, %v733_v50  ;;  %v747_v39 = vmul.f32 %v2366_v3, %v730_v53 }
 0x174   :  { %v2407_v49 = vsub.f32 %v706_v38, %v748_v43  ;;  %v2409_v4 = vsub.f32 %v705_v59, %v747_v39 }
 0x176   :  { %v763_v54 = vmul.f32 %v2409_v4, %v2409_v4  ;;  %v764_v6 = vmul.f32 %v2407_v49, %v2407_v49 }
 0x178   :  { %v783_v60 = vsel %vm709_vm3, %v763_v54, 0.0  ;;  %v786_v27 = vsel %vm709_vm3, %v764_v6, 0.0 }
 0x179   :  { %784 = vadd.xlane.f32.xlu0 %v783_v60  ;;  %787 = vadd.xlane.f32.xlu1 %v786_v27 }
 0x19a   :  { %v773_v32 = vpop.xlane.xlu2 %772 }
 0x19b   :  { %v791_v34 = vmul.f32 %v773_v32, %v2366_v3 }
 0x19d   :  { %v799_v57 = vadd.f32 1e-05, %v791_v34 }
 0x19f   :  { %1600 = vrsqrt.f32 %v799_v57  ;;  %vm831_vm15 = vweird.f32 %v799_v57 }
 0x1a5   :  { %v1601_v5 = vpop.eup %1600 }
 0x1a6   :  { %v826_v58 = vmul.f32 %v1601_v5, %v799_v57  ;;  %vm832_vm14 = vweird.f32 %v1601_v5 }
 0x1a7   :  { %vm833_vm0 = vmor %vm831_vm15, %vm832_vm14 }
 0x1a8   :  { %v827_v41 = vmul.f32 %v1601_v5, %v826_v58 }
 0x1aa   :  { %v828_v37 = vmul.f32 0.5, %v827_v41 }
 0x1ac   :  { %v829_v7 = vsub.f32 1.5, %v828_v37 }
 0x1ae   :  { %v830_v48 = vmul.f32 %v1601_v5, %v829_v7 }
 0x1b0   :  { %v834_v31 = vsel %vm833_vm0, %v1601_v5, %v830_v48 }
 0x1b1   :  { %v887_v38 = vmul.f32 %v834_v31, %v751_v8 }
 0x1b3   :  { %v896_v59 = vmul.f32 %v2421_v29, %v887_v38 }
 0x1b4   :  { %v770_v52 = vpop.xlane.xlu1 %769  ;;  %v767_v1 = vpop.xlane.xlu0 %766 }
 0x1b5   :  { %v905_v30 = vadd.f32 %v2426_v44, %v896_v59  ;;  %v790_v0 = vmul.f32 %v770_v52, %v2366_v3  ;;  %v789_v62 = vmul.f32 %v767_v1, %v2366_v3 }
 0x1b7   :  { %916 = vst.msk [vmem:[#allocation3 + $0x11] sm:$0xff] %vm709_vm3, %v905_v30  ;;  %v798_v2 = vadd.f32 1e-05, %v790_v0  ;;  %v797_v42 = vadd.f32 1e-05, %v789_v62 }
 0x1b9   :  { %1602 = vrsqrt.f32 %v798_v2  ;;  %vm821_vm13 = vweird.f32 %v798_v2  ;;  %vm811_vm6 = vweird.f32 %v797_v42 }
 0x1ba   :  { %1604 = vrsqrt.f32 %v797_v42 }
 0x1bf   :  { %v1603_v11 = vpop.eup %1602 }
 0x1c0   :  { %v1605_v12 = vpop.eup %1604  ;;  %v816_v10 = vmul.f32 %v1603_v11, %v798_v2  ;;  %v776_v8 = vpop.xlane.xlu0 %775  ;;  %vm822_vm2 = vweird.f32 %v1603_v11 }
 0x1c1   :  { %v806_v9 = vmul.f32 %v1605_v12, %v797_v42  ;;  %v792_v22 = vmul.f32 %v776_v8, %v2366_v3  ;;  %vm812_vm5 = vweird.f32 %v1605_v12  ;;  %vm823_vm4 = vmor %vm821_vm13, %vm822_vm2 }
 0x1c2   :  { %v817_v20 = vmul.f32 %v1603_v11, %v816_v10  ;;  %vm813_vm7 = vmor %vm811_vm6, %vm812_vm5 }
 0x1c3   :  { %v807_v13 = vmul.f32 %v1605_v12, %v806_v9  ;;  %v800_v14 = vadd.f32 1e-05, %v792_v22 }
 0x1c4   :  { %v818_v18 = vmul.f32 0.5, %v817_v20 }
 0x1c5   :  { %v808_v47 = vmul.f32 0.5, %v807_v13  ;;  %1606 = vrsqrt.f32 %v800_v14  ;;  %vm841_vm9 = vweird.f32 %v800_v14 }
 0x1c6   :  { %v819_v17 = vsub.f32 1.5, %v818_v18 }
 0x1c7   :  { %v809_v24 = vsub.f32 1.5, %v808_v47 }
 0x1c8   :  { %v820_v61 = vmul.f32 %v1603_v11, %v819_v17 }
 0x1c9   :  { %v810_v16 = vmul.f32 %v1605_v12, %v809_v24 }
 0x1ca   :  { %v824_v28 = vsel %vm823_vm4, %v1603_v11, %v820_v61 }
 0x1cb   :  { %v1607_v51 = vpop.eup %1606  ;;  %v886_v45 = vmul.f32 %v824_v28, %v2374_v25  ;;  %v814_v19 = vsel %vm813_vm7, %v1605_v12, %v810_v16 }
 0x1cc   :  { %v885_v55 = vmul.f32 %v814_v19, %v2377_v15  ;;  %v836_v56 = vmul.f32 %v1607_v51, %v800_v14  ;;  %vm842_vm8 = vweird.f32 %v1607_v51 }
 0x1cd   :  { %v895_v33 = vmul.f32 %v2421_v29, %v886_v45  ;;  %vm843_vm10 = vmor %vm841_vm9, %vm842_vm8  ;;  %vm941_vm8 = vcmask 130112   ;;  %vm956_vm9 = vcmask 195712  }
 0x1ce   :  { %v894_v35 = vmul.f32 %v2421_v29, %v885_v55  ;;  %v837_v36 = vmul.f32 %v1607_v51, %v836_v56 }
 0x1cf   :  { %v904_v63 = vadd.f32 %v2426_v44, %v895_v33 }
 0x1d0   :  { %v903_v26 = vadd.f32 %v2426_v44, %v894_v35  ;;  %v838_v46 = vmul.f32 0.5, %v837_v36 }
 0x1d1   :  { %915 = vst.msk [vmem:[#allocation3 + $0x9] sm:$0xff] %vm709_vm3, %v904_v63 }
 0x1d2   :  { %914 = vst.msk [vmem:[#allocation3 + $0x1] sm:$0xff] %vm709_vm3, %v903_v26  ;;  %v839_v50 = vsub.f32 1.5, %v838_v46 }
 0x1d4   :  { %v840_v25 = vmul.f32 %v1607_v51, %v839_v50 }
 0x1d6   :  { %v844_v15 = vsel %vm843_vm10, %v1607_v51, %v840_v25  ;;  %vm971_vm10 = vcmask 261312  }
 0x1d7   :  { %v888_v53 = vmul.f32 %v844_v15, %v2387_v40 }
 0x1d9   :  { %v897_v43 = vmul.f32 %v2421_v29, %v888_v53  ;;  %v960_v39 = vld [vmem:[#allocation3 + $0x3] ss:$2 sm:$0xff]  ;;  %v945_v54 = vld [vmem:[#allocation3 + $0x2] ss:$2 sm:$0xff] }
 0x1da   :  { %v930_v6 = vld [vmem:[#allocation3 + $0x1] ss:$2 sm:$0xff]  ;;  %965 = vrot.lane.b32.xlu1 %v960_v39, %s1674_s16  ;;  %950 = vrot.lane.b32.xlu0 %v945_v54, %s1675_s17  ;;  %v924_v60 = vld [vmem:[#allocation3] ss:$2 sm:$0xff] }
 0x1db   :  { %v906_v27 = vadd.f32 %v2426_v44, %v897_v43  ;;  %935 = vrot.lane.b32.xlu2 %v930_v6, %s1676_s18  ;;  %927 = vst.msk [vmem:[#allocation6] sm:$0xff] %vm709_vm3, %v924_v60 }
 0x1dd   :  { %917 = vst.msk [vmem:[#allocation3 + $0x19] sm:$0xff] %vm709_vm3, %v906_v27 }
 0x1de   :  { %v782_v40 = vpop.xlane.xlu2 %781 }
 0x1df   :  { %v794_v32 = vmul.f32 %v782_v40, %v2366_v3 }
 0x1e1   :  { %v802_v34 = vadd.f32 1e-05, %v794_v32  ;;  %v1029_v32 = vld [vmem:[%s2679_s3 + $0x18] sm:$0xff] }
 0x1e2   :  { %1057 = vmatpush.msra.mxu0 %v1029_v32  ;;  %1530 = vmatpush.msra.mxu2 %v1029_v32 }
 0x1e3   :  { %1608 = vrsqrt.f32 %v802_v34  ;;  %vm861_vm12 = vweird.f32 %v802_v34  ;;  %1531 = vmatpush.msra.mxu3 %v1029_v32 }
 0x1e4   :  { %v779_v57 = vpop.xlane.xlu1 %778  ;;  %v962_v5 = vld [vmem:[#allocation3 + $0x13] ss:$2 sm:$0xff]  ;;  %v947_v58 = vld [vmem:[#allocation3 + $0x12] ss:$2 sm:$0xff] }
 0x1e5   :  { %v932_v41 = vld [vmem:[#allocation3 + $0x11] ss:$2 sm:$0xff]  ;;  %v793_v37 = vmul.f32 %v779_v57, %v2366_v3  ;;  %967 = vrot.lane.b32.xlu1 %v962_v5, %s1674_s16  ;;  %952 = vrot.lane.b32.xlu2 %v947_v58, %s1675_s17  ;;  %v926_v7 = vld [vmem:[#allocation3 + $0x10] ss:$2 sm:$0xff]  ;;  %v1027_v57 = vld [vmem:[%s2679_s3 + $0x8] sm:$0xff] }
 0x1e6   :  { %937 = vrot.lane.b32.xlu0 %v932_v41, %s1676_s18  ;;  %928 = vst.msk [vmem:[#allocation6 + $0x8] sm:$0xff] %vm709_vm3, %v926_v7  ;;  %v1026_v5 = vld [vmem:[%s2679_s3] sm:$0xff] }
 0x1e7   :  { %v801_v48 = vadd.f32 1e-05, %v793_v37 }
 0x1e9   :  { %v1609_v31 = vpop.eup %1608  ;;  %1610 = vrsqrt.f32 %v801_v48  ;;  %vm851_vm0 = vweird.f32 %v801_v48 }
 0x1ea   :  { %v856_v38 = vmul.f32 %v1609_v31, %v802_v34  ;;  %vm862_vm11 = vweird.f32 %v1609_v31  ;;  %v1028_v34 = vld [vmem:[%s2679_s3 + $0x10] sm:$0xff] }
 0x1eb   :  { %vm863_vm14 = vmor %vm861_vm12, %vm862_vm11  ;;  %1058 = vmatpush.msra.mxu0 %v1028_v34  ;;  %1532 = vmatpush.msra.mxu2 %v1028_v34  ;;  %vm1032_vm11 = vcmask 261120  }
 0x1ec   :  { %v857_v59 = vmul.f32 %v1609_v31, %v856_v38  ;;  %v788_v52 = vpop.xlane.xlu1 %787  ;;  %v785_v30 = vpop.xlane.xlu0 %784  ;;  %1533 = vmatpush.msra.mxu3 %v1028_v34 }
 0x1ed   :  { %v796_v0 = vmul.f32 %v788_v52, %v2366_v3  ;;  %v795_v1 = vmul.f32 %v785_v30, %v2366_v3  ;;  %1059 = vmatpush.msra.mxu0 %v1027_v57  ;;  %1534 = vmatpush.msra.mxu2 %v1027_v57 }
 0x1ee   :  { %v858_v62 = vmul.f32 0.5, %v857_v59  ;;  %1535 = vmatpush.msra.mxu3 %v1027_v57 }
 0x1ef   :  { %v1611_v2 = vpop.eup %1610  ;;  %v804_v42 = vadd.f32 1e-05, %v796_v0  ;;  %v803_v11 = vadd.f32 1e-05, %v795_v1  ;;  %1060 = vmatpush.msra.mxu0 %v1026_v5  ;;  %1536 = vmatpush.msra.mxu2 %v1026_v5 }
 0x1f0   :  { %v859_v12 = vsub.f32 1.5, %v858_v62  ;;  %v846_v10 = vmul.f32 %v1611_v2, %v801_v48  ;;  %vm852_vm15 = vweird.f32 %v1611_v2  ;;  %1537 = vmatpush.msra.mxu3 %v1026_v5 }
 0x1f1   :  { %1612 = vrsqrt.f32 %v804_v42  ;;  %vm853_vm1 = vmor %vm851_vm0, %vm852_vm15  ;;  %vm881_vm13 = vweird.f32 %v804_v42  ;;  %vm871_vm6 = vweird.f32 %v803_v11 }
 0x1f2   :  { %v860_v8 = vmul.f32 %v1609_v31, %v859_v12  ;;  %v847_v9 = vmul.f32 %v1611_v2, %v846_v10  ;;  %1614 = vrsqrt.f32 %v803_v11  ;;  %v1556_v12 = vld [vmem:[%s2680_s4 + $0x1] ss:$0 sm:$0xff] }
 0x1f4   :  { %v864_v22 = vsel %vm863_vm14, %v1609_v31, %v860_v8  ;;  %v848_v20 = vmul.f32 0.5, %v847_v9  ;;  %v1079_v8 = vstv %s1515_s25 }
 0x1f5   :  { %v890_v13 = vmul.f32 %v864_v22, %v2394_v23 }
 0x1f6   :  { %v849_v14 = vsub.f32 1.5, %v848_v20 }
 0x1f7   :  { %v1613_v18 = vpop.eup %1612  ;;  %v899_v47 = vmul.f32 %v2421_v29, %v890_v13 }
 0x1f8   :  { %v1615_v17 = vpop.eup %1614  ;;  %v850_v24 = vmul.f32 %v1611_v2, %v849_v14  ;;  %v876_v61 = vmul.f32 %v1613_v18, %v804_v42  ;;  %vm882_vm2 = vweird.f32 %v1613_v18 }
 0x1f9   :  { %v908_v16 = vadd.f32 %v2426_v44, %v899_v47  ;;  %v866_v28 = vmul.f32 %v1615_v17, %v803_v11  ;;  %vm872_vm5 = vweird.f32 %v1615_v17  ;;  %vm883_vm4 = vmor %vm881_vm13, %vm882_vm2 }
 0x1fa   :  { %v854_v51 = vsel %vm853_vm1, %v1611_v2, %v850_v24  ;;  %v877_v45 = vmul.f32 %v1613_v18, %v876_v61  ;;  %vm873_vm7 = vmor %vm871_vm6, %vm872_vm5 }
 0x1fb   :  { %921 = vst.msk [vmem:[#allocation3 + $0x2b] sm:$0xff] %vm709_vm3, %v908_v16  ;;  %v889_v19 = vmul.f32 %v854_v51, %v2400_v21  ;;  %v867_v23 = vmul.f32 %v1615_v17, %v866_v28 }
 0x1fc   :  { %v878_v55 = vmul.f32 0.5, %v877_v45 }
 0x1fd   :  { %v898_v56 = vmul.f32 %v2421_v29, %v889_v19  ;;  %v868_v33 = vmul.f32 0.5, %v867_v23 }
 0x1fe   :  { %v879_v35 = vsub.f32 1.5, %v878_v55 }
 0x1ff   :  { %v907_v36 = vadd.f32 %v2426_v44, %v898_v56  ;;  %v869_v63 = vsub.f32 1.5, %v868_v33 }
 0x200   :  { %v880_v26 = vmul.f32 %v1613_v18, %v879_v35 }
 0x201   :  { %920 = vst.msk [vmem:[#allocation3 + $0x23] sm:$0xff] %vm709_vm3, %v907_v36  ;;  %v870_v46 = vmul.f32 %v1615_v17, %v869_v63 }
 0x202   :  { %v884_v50 = vsel %vm883_vm4, %v1613_v18, %v880_v26 }
 0x203   :  { %v892_v21 = vmul.f32 %v884_v50, %v2407_v49  ;;  %v874_v25 = vsel %vm873_vm7, %v1615_v17, %v870_v46 }
 0x204   :  { %v891_v15 = vmul.f32 %v874_v25, %v2409_v4 }
 0x205   :  { %v901_v53 = vmul.f32 %v2421_v29, %v892_v21 }
 0x206   :  { %v900_v43 = vmul.f32 %v2421_v29, %v891_v15 }
 0x207   :  { %v910_v39 = vadd.f32 %v2426_v44, %v901_v53 }
 0x208   :  { %v909_v54 = vadd.f32 %v2426_v44, %v900_v43  ;;  %v995_v6 = vld [vmem:[#allocation3 + $0x24] ss:$2 sm:$0xff]  ;;  %v981_v60 = vld [vmem:[#allocation3 + $0x23] ss:$2 sm:$0xff] }
 0x209   :  { %v975_v27 = vld [vmem:[#allocation3 + $0x22] ss:$2 sm:$0xff]  ;;  %923 = vst.msk [vmem:[#allocation3 + $0x3b] sm:$0xff] %vm709_vm3, %v910_v39  ;;  %1000 = vrot.lane.b32.xlu1 %v995_v6, %s1675_s17  ;;  %986 = vrot.lane.b32.xlu0 %v981_v60, %s1676_s18 }
 0x20a   :  { %922 = vst.msk [vmem:[#allocation3 + $0x33] sm:$0xff] %vm709_vm3, %v909_v54 }
 0x20b   :  { %978 = vst.msk [vmem:[#allocation6 + $0x10] sm:$0xff] %vm709_vm3, %v975_v27 }
 0x211   :  { %v1011_v49 = vld [vmem:[#allocation3 + $0x35] ss:$2 sm:$0xff]  ;;  %v997_v4 = vld [vmem:[#allocation3 + $0x34] ss:$2 sm:$0xff]  ;;  %v1009_v40 = vld [vmem:[#allocation3 + $0x25] ss:$2 sm:$0xff] }
 0x212   :  { %v983_v29 = vld [vmem:[#allocation3 + $0x33] ss:$2 sm:$0xff]  ;;  %1016 = vrot.lane.b32.xlu1 %v1011_v49, %s1674_s16  ;;  %1002 = vrot.lane.b32.xlu0 %v997_v4, %s1675_s17  ;;  %v977_v44 = vld [vmem:[#allocation3 + $0x32] ss:$2 sm:$0xff] }
 0x213   :  { %988 = vrot.lane.b32.xlu2 %v983_v29, %s1676_s18  ;;  %979 = vst.msk [vmem:[#allocation6 + $0x18] sm:$0xff] %vm709_vm3, %v977_v44 }
 0x21b   :  { %1014 = vrot.lane.b32.xlu2 %v1009_v40, %s1674_s16 }
 0x235   :  { %v936_v58 = vpop.permute.xlu2 %935 }
 0x236   :  { %942 = vst.msk [vmem:[#allocation6] sm:$0xff] %vm941_vm8, %v936_v58 }
 0x23f   :  { %v953_v31 = vpop.permute.xlu2 %952 }
 0x24c   :  { %v966_v41 = vpop.permute.xlu1 %965  ;;  %v951_v37 = vpop.permute.xlu0 %950 }
 0x24d   :  { %957 = vst.msk [vmem:[#allocation6] sm:$0xff] %vm956_vm9, %v951_v37 }
 0x24e   :  { %972 = vst.msk [vmem:[#allocation6] sm:$0xff] %vm971_vm10, %v966_v41 }
 0x255   :  { %v1022_v7 = vld [vmem:[#allocation6] sm:$0xff] }
 0x256   :  { %1511 = vmatmul.msk.f32.vlgmr.msra.gmra.mxu0 %vm1032_vm11, %v1022_v7 }
 0x257   :  { %v968_v38 = vpop.permute.xlu1 %967 }
 0x258   :  { %v938_v48 = vpop.permute.xlu0 %937 }
 0x259   :  { %943 = vst.msk [vmem:[#allocation6 + $0x8] sm:$0xff] %vm941_vm8, %v938_v48 }
 0x25a   :  { %958 = vst.msk [vmem:[#allocation6 + $0x8] sm:$0xff] %vm956_vm9, %v953_v31 }
 0x25b   :  { %973 = vst.msk [vmem:[#allocation6 + $0x8] sm:$0xff] %vm971_vm10, %v968_v38 }
 0x262   :  { %v1023_v59 = vld [vmem:[#allocation6 + $0x8] sm:$0xff] }
 0x263   :  { %1512 = vmatmul.msk.f32.gmra.mxu0 %vm1032_vm11, %v1023_v59  ;;  %v2562_v59 = vld [vmem:[%s2681_s5 + $0x1] ss:$0 sm:$0xff] }
 0x26d   :  { %v989_v52 = vpop.permute.xlu2 %988 }
 0x26e   :  { %993 = vst.msk [vmem:[#allocation6 + $0x18] sm:$0xff] %vm941_vm8, %v989_v52 }
 0x275   :  { %v1015_v1 = vpop.permute.xlu2 %1014 }
 0x27b   :  { %v1001_v30 = vpop.permute.xlu1 %1000  ;;  %v987_v0 = vpop.permute.xlu0 %986 }
 0x27c   :  { %992 = vst.msk [vmem:[#allocation6 + $0x10] sm:$0xff] %vm941_vm8, %v987_v0 }
 0x27d   :  { %1006 = vst.msk [vmem:[#allocation6 + $0x10] sm:$0xff] %vm956_vm9, %v1001_v30  ;;  %v1558_v30 = vld [vmem:[%s2682_s6 + $0x1] ss:$0 sm:$0xff] }
 0x27e   :  { %1020 = vst.msk [vmem:[#allocation6 + $0x10] sm:$0xff] %vm971_vm10, %v1015_v1 }
 0x284   :  { %v1017_v62 = vpop.permute.xlu1 %1016  ;;  %v1003_v2 = vpop.permute.xlu0 %1002 }
 0x285   :  { %1007 = vst.msk [vmem:[#allocation6 + $0x18] sm:$0xff] %vm956_vm9, %v1003_v2  ;;  %v1024_v42 = vld [vmem:[#allocation6 + $0x10] sm:$0xff] }
 0x286   :  { %1021 = vst.msk [vmem:[#allocation6 + $0x18] sm:$0xff] %vm971_vm10, %v1017_v62  ;;  %1513 = vmatmul.msk.f32.vlgmr.msra.gmra.mxu2 %vm1032_vm11, %v1024_v42 }
 0x28d   :  { %v1025_v11 = vld [vmem:[#allocation6 + $0x18] sm:$0xff] }
 0x28e   :  { %1514 = vmatmul.msk.f32.vlgmr.msra.gmra.mxu3 %vm1032_vm11, %v1025_v11 }
 0x2d3   :  { %v1062_v10 = vpop.f32.mrf.mxu0 }
 0x2d4   :  { %v1063_v9 = vadd.f32 %v1556_v12, %v1062_v10 }
 0x2d6   :  { %v1080_v22 = vmul.f32 %v1079_v8, %v1063_v9  ;;  %vm1074_vm12 = vcmp.ge.f32.partialorder %v1063_v9, 0.0 }
 0x2d8   :  { %v1084_v20 = vsel %vm1074_vm12, %v1063_v9, %v1080_v22 }
 0x2d9   :  { %v1090_v13 = vsel %vm709_vm3, %v1084_v20, 0.0 }
 0x2da   :  { %1091 = vadd.xlane.f32.xlu0 %v1090_v13 }
 0x2e0   :  { %v1065_v14 = vpop.f32.mrf.mxu0 }
 0x2e1   :  { %v1066_v18 = vadd.f32 %v1556_v12, %v1065_v14 }
 0x2e3   :  { %v1081_v47 = vmul.f32 %v1079_v8, %v1066_v18  ;;  %vm1075_vm14 = vcmp.ge.f32.partialorder %v1066_v18, 0.0 }
 0x2e5   :  { %v1085_v17 = vsel %vm1075_vm14, %v1066_v18, %v1081_v47 }
 0x2e6   :  { %v1093_v24 = vsel %vm709_vm3, %v1085_v17, 0.0 }
 0x2e7   :  { %1094 = vadd.xlane.f32.xlu2 %v1093_v24 }
 0x309   :  { %v1068_v61 = vpop.f32.mrf.mxu2 }
 0x30a   :  { %v1069_v16 = vadd.f32 %v1556_v12, %v1068_v61 }
 0x30c   :  { %v1082_v28 = vmul.f32 %v1079_v8, %v1069_v16  ;;  %vm1076_vm15 = vcmp.ge.f32.partialorder %v1069_v16, 0.0 }
 0x30e   :  { %v1086_v51 = vsel %vm1076_vm15, %v1069_v16, %v1082_v28 }
 0x30f   :  { %v1096_v45 = vsel %vm709_vm3, %v1086_v51, 0.0 }
 0x310   :  { %1097 = vadd.xlane.f32.xlu1 %v1096_v45 }
 0x311   :  { %v1071_v19 = vpop.f32.mrf.mxu3 }
 0x312   :  { %v1072_v23 = vadd.f32 %v1556_v12, %v1071_v19 }
 0x314   :  { %v1083_v55 = vmul.f32 %v1079_v8, %v1072_v23  ;;  %vm1077_vm0 = vcmp.ge.f32.partialorder %v1072_v23, 0.0 }
 0x316   :  { %v1087_v56 = vsel %vm1077_vm0, %v1072_v23, %v1083_v55 }
 0x317   :  { %v1099_v33 = vsel %vm709_vm3, %v1087_v56, 0.0 }
 0x318   :  { %1100 = vadd.xlane.f32.xlu0 %v1099_v33 }
 0x34d   :  { %v1092_v35 = vpop.xlane.xlu0 %1091 }
 0x34e   :  { %v1102_v36 = vmul.f32 %v1092_v35, %v2366_v3 }
 0x350   :  { %v1106_v63 = vsub.f32 %v1084_v20, %v1102_v36 }
 0x352   :  { %v1110_v26 = vmul.f32 %v1106_v63, %v1106_v63 }
 0x354   :  { %v1114_v46 = vsel %vm709_vm3, %v1110_v26, 0.0 }
 0x355   :  { %1115 = vadd.xlane.f32.xlu2 %v1114_v46 }
 0x35a   :  { %v1095_v50 = vpop.xlane.xlu2 %1094 }
 0x35b   :  { %v1103_v21 = vmul.f32 %v1095_v50, %v2366_v3 }
 0x35d   :  { %v1107_v25 = vsub.f32 %v1085_v17, %v1103_v21 }
 0x35f   :  { %v1111_v15 = vmul.f32 %v1107_v25, %v1107_v25 }
 0x361   :  { %v1117_v53 = vsel %vm709_vm3, %v1111_v15, 0.0 }
 0x362   :  { %1118 = vadd.xlane.f32.xlu1 %v1117_v53 }
 0x383   :  { %v1098_v43 = vpop.xlane.xlu1 %1097 }
 0x384   :  { %v1104_v39 = vmul.f32 %v1098_v43, %v2366_v3 }
 0x386   :  { %v2546_v54 = vsub.f32 %v1086_v51, %v1104_v39 }
 0x388   :  { %v1112_v6 = vmul.f32 %v2546_v54, %v2546_v54 }
 0x38a   :  { %v1120_v60 = vsel %vm709_vm3, %v1112_v6, 0.0 }
 0x38b   :  { %v1101_v27 = vpop.xlane.xlu0 %1100  ;;  %1121 = vadd.xlane.f32.xlu0 %v1120_v60 }
 0x38c   :  { %v1105_v49 = vmul.f32 %v1101_v27, %v2366_v3 }
 0x38e   :  { %v2552_v4 = vsub.f32 %v1087_v56, %v1105_v49 }
 0x390   :  { %v1113_v29 = vmul.f32 %v2552_v4, %v2552_v4 }
 0x392   :  { %v1123_v44 = vsel %vm709_vm3, %v1113_v29, 0.0 }
 0x393   :  { %1124 = vadd.xlane.f32.xlu2 %v1123_v44 }
 0x3c8   :  { %v1116_v40 = vpop.xlane.xlu2 %1115 }
 0x3c9   :  { %v1126_v32 = vmul.f32 %v1116_v40, %v2366_v3  ;;  %v1518_v40 = vld [vmem:[%s2679_s3 + $0x30] sm:$0xff] }
 0x3cb   :  { %v1130_v34 = vadd.f32 1e-05, %v1126_v32  ;;  %v1517_v32 = vld [vmem:[%s2679_s3 + $0x28] sm:$0xff] }
 0x3cd   :  { %1616 = vrsqrt.f32 %v1130_v34  ;;  %vm1140_vm2 = vweird.f32 %v1130_v34 }
 0x3d3   :  { %v1617_v57 = vpop.eup %1616 }
 0x3d4   :  { %v1135_v5 = vmul.f32 %v1617_v57, %v1130_v34  ;;  %vm1141_vm1 = vweird.f32 %v1617_v57  ;;  %v1516_v34 = vld [vmem:[%s2679_s3 + $0x20] sm:$0xff] }
 0x3d5   :  { %v1119_v58 = vpop.xlane.xlu1 %1118  ;;  %vm1142_vm5 = vmor %vm1140_vm2, %vm1141_vm1 }
 0x3d6   :  { %v1136_v41 = vmul.f32 %v1617_v57, %v1135_v5  ;;  %v1127_v37 = vmul.f32 %v1119_v58, %v2366_v3 }
 0x3d8   :  { %v1137_v7 = vmul.f32 0.5, %v1136_v41  ;;  %v1131_v48 = vadd.f32 1e-05, %v1127_v37 }
 0x3da   :  { %v1138_v31 = vsub.f32 1.5, %v1137_v7  ;;  %1618 = vrsqrt.f32 %v1131_v48  ;;  %vm1150_vm4 = vweird.f32 %v1131_v48 }
 0x3dc   :  { %v1139_v38 = vmul.f32 %v1617_v57, %v1138_v31 }
 0x3de   :  { %v1143_v52 = vsel %vm1142_vm5, %v1617_v57, %v1139_v38  ;;  %v1559_v38 = vld [vmem:[%s2680_s4 + $0x2] ss:$0 sm:$0xff] }
 0x3df   :  { %v1174_v0 = vmul.f32 %v1143_v52, %v1106_v63  ;;  %v1284_v52 = vstv %s1522_s20  ;;  %s1497_s20 = sshll.u32 %s1677_s1, 4  ;;  %s1498_s20 = int_to_ptr.vmem [resolvable:$true] %s1497_s20 }
 0x3e0   :  { %v1619_v1 = vpop.eup %1618 }
 0x3e1   :  { %v1179_v62 = vmul.f32 %v2562_v59, %v1174_v0  ;;  %v1145_v2 = vmul.f32 %v1619_v1, %v1131_v48  ;;  %vm1151_vm13 = vweird.f32 %v1619_v1 }
 0x3e2   :  { %vm1152_vm6 = vmor %vm1150_vm4, %vm1151_vm13  ;;  %vm1348_vm13 = vcmask 60416  }
 0x3e3   :  { %v1184_v42 = vadd.f32 %v1558_v30, %v1179_v62  ;;  %v1146_v11 = vmul.f32 %v1619_v1, %v1145_v2 }
 0x3e5   :  { %1190 = vst.msk [vmem:[#allocation4 + $0x1] sm:$0xff] %vm709_vm3, %v1184_v42  ;;  %v1147_v12 = vmul.f32 0.5, %v1146_v11 }
 0x3e7   :  { %v1148_v10 = vsub.f32 1.5, %v1147_v12 }
 0x3e9   :  { %v1149_v8 = vmul.f32 %v1619_v1, %v1148_v10 }
 0x3eb   :  { %v1153_v9 = vsel %vm1152_vm6, %v1619_v1, %v1149_v8 }
 0x3ec   :  { %v1175_v22 = vmul.f32 %v1153_v9, %v1107_v25 }
 0x3ee   :  { %v1180_v20 = vmul.f32 %v2562_v59, %v1175_v22 }
 0x3f0   :  { %v1185_v13 = vadd.f32 %v1558_v30, %v1180_v20 }
 0x3f2   :  { %1191 = vst.msk [vmem:[#allocation4 + $0x9] sm:$0xff] %vm709_vm3, %v1185_v13 }
 0x3f9   :  { %v1206_v14 = vld [vmem:[#allocation4 + $0x2] ss:$2 sm:$0xff]  ;;  %v1199_v18 = vld [vmem:[#allocation4 + $0x1] ss:$2 sm:$0xff] }
 0x3fa   :  { %v1213_v47 = vld [vmem:[#allocation4 + $0x3] ss:$2 sm:$0xff]  ;;  %1208 = vrot.lane.b32.xlu0 %v1206_v14, %s1675_s17  ;;  %1201 = vrot.lane.b32.xlu1 %v1199_v18, %s1676_s18  ;;  %v1196_v17 = vld [vmem:[#allocation4] ss:$2 sm:$0xff] }
 0x3fb   :  { %1215 = vrot.lane.b32.xlu2 %v1213_v47, %s1674_s16  ;;  %1197 = vst.msk [vmem:[#allocation6] sm:$0xff] %vm709_vm3, %v1196_v17 }
 0x3fe   :  { %v1122_v24 = vpop.xlane.xlu0 %1121 }
 0x3ff   :  { %v1128_v61 = vmul.f32 %v1122_v24, %v2366_v3 }
 0x401   :  { %v1132_v16 = vadd.f32 1e-05, %v1128_v61 }
 0x403   :  { %1620 = vrsqrt.f32 %v1132_v16  ;;  %vm1160_vm12 = vweird.f32 %v1132_v16 }
 0x406   :  { %v1125_v28 = vpop.xlane.xlu2 %1124 }
 0x407   :  { %v1129_v51 = vmul.f32 %v1125_v28, %v2366_v3 }
 0x409   :  { %v1621_v45 = vpop.eup %1620  ;;  %v1133_v19 = vadd.f32 1e-05, %v1129_v51 }
 0x40a   :  { %v1155_v23 = vmul.f32 %v1621_v45, %v1132_v16  ;;  %vm1161_vm7 = vweird.f32 %v1621_v45 }
 0x40b   :  { %1622 = vrsqrt.f32 %v1133_v19  ;;  %vm1162_vm14 = vmor %vm1160_vm12, %vm1161_vm7  ;;  %vm1170_vm0 = vweird.f32 %v1133_v19  ;;  %vm1356_vm12 = vcmask 126016  }
 0x40c   :  { %v1156_v55 = vmul.f32 %v1621_v45, %v1155_v23 }
 0x40e   :  { %v1157_v56 = vmul.f32 0.5, %v1156_v55 }
 0x410   :  { %v1158_v33 = vsub.f32 1.5, %v1157_v56 }
 0x411   :  { %v1623_v35 = vpop.eup %1622 }
 0x412   :  { %v1159_v36 = vmul.f32 %v1621_v45, %v1158_v33  ;;  %v1165_v63 = vmul.f32 %v1623_v35, %v1133_v19  ;;  %vm1171_vm15 = vweird.f32 %v1623_v35  ;;  %v1560_v33 = vld [vmem:[%s2681_s5 + $0x2] ss:$0 sm:$0xff] }
 0x413   :  { %vm1172_vm1 = vmor %vm1170_vm0, %vm1171_vm15  ;;  %vm1372_vm15 = vcmask 257216  }
 0x414   :  { %v1163_v26 = vsel %vm1162_vm14, %v1621_v45, %v1159_v36  ;;  %v1166_v46 = vmul.f32 %v1623_v35, %v1165_v63  ;;  %v1561_v36 = vld [vmem:[%s2682_s6 + $0x2] ss:$0 sm:$0xff]  ;;  %vm1364_vm14 = vcmask 191616  }
 0x415   :  { %v1176_v50 = vmul.f32 %v1163_v26, %v2546_v54 }
 0x416   :  { %v1167_v21 = vmul.f32 0.5, %v1166_v46 }
 0x417   :  { %v1181_v25 = vmul.f32 %v2562_v59, %v1176_v50 }
 0x418   :  { %v1168_v15 = vsub.f32 1.5, %v1167_v21 }
 0x419   :  { %v1186_v53 = vadd.f32 %v1558_v30, %v1181_v25 }
 0x41a   :  { %v1169_v43 = vmul.f32 %v1623_v35, %v1168_v15 }
 0x41b   :  { %1194 = vst.msk [vmem:[#allocation4 + $0x13] sm:$0xff] %vm709_vm3, %v1186_v53 }
 0x41c   :  { %v1173_v39 = vsel %vm1172_vm1, %v1623_v35, %v1169_v43 }
 0x41d   :  { %v1177_v6 = vmul.f32 %v1173_v39, %v2552_v4  ;;  %v1519_v4 = vld [vmem:[%s2679_s3 + $0x38] sm:$0xff] }
 0x41e   :  { %1270 = vmatpush.msra.mxu1 %v1519_v4 }
 0x41f   :  { %v1182_v60 = vmul.f32 %v2562_v59, %v1177_v6 }
 0x420   :  { %1271 = vmatpush.msra.mxu1 %v1518_v40 }
 0x421   :  { %v1187_v27 = vadd.f32 %v1558_v30, %v1182_v60 }
 0x422   :  { %1272 = vmatpush.msra.mxu1 %v1517_v32 }
 0x423   :  { %1195 = vst.msk [vmem:[#allocation4 + $0x1b] sm:$0xff] %vm709_vm3, %v1187_v27 }
 0x424   :  { %1273 = vmatpush.msra.mxu1 %v1516_v34 }
 0x42a   :  { %v1237_v54 = vld [vmem:[#allocation4 + $0x15] ss:$2 sm:$0xff]  ;;  %v1230_v49 = vld [vmem:[#allocation4 + $0x14] ss:$2 sm:$0xff] }
 0x42b   :  { %v1223_v29 = vld [vmem:[#allocation4 + $0x13] ss:$2 sm:$0xff]  ;;  %1239 = vrot.lane.b32.xlu2 %v1237_v54, %s1674_s16  ;;  %1232 = vrot.lane.b32.xlu1 %v1230_v49, %s1675_s17  ;;  %v1220_v44 = vld [vmem:[#allocation4 + $0x12] ss:$2 sm:$0xff] }
 0x42c   :  { %1225 = vrot.lane.b32.xlu0 %v1223_v29, %s1676_s18  ;;  %1221 = vst.msk [vmem:[#allocation6 + $0x8] sm:$0xff] %vm709_vm3, %v1220_v44 }
 0x455   :  { %v1216_v58 = vpop.permute.xlu2 %1215 }
 0x46c   :  { %v1202_v57 = vpop.permute.xlu1 %1201  ;;  %v1209_v5 = vpop.permute.xlu0 %1208 }
 0x46d   :  { %1204 = vst.msk [vmem:[#allocation6] sm:$0xff] %vm941_vm8, %v1202_v57 }
 0x46e   :  { %1211 = vst.msk [vmem:[#allocation6] sm:$0xff] %vm956_vm9, %v1209_v5 }
 0x46f   :  { %1218 = vst.msk [vmem:[#allocation6] sm:$0xff] %vm971_vm10, %v1216_v58 }
 0x476   :  { %v1243_v41 = vld [vmem:[#allocation6] sm:$0xff] }
 0x477   :  { %1520 = vmatmul.msk.f32.vlgmr.msra.gmra.mxu1 %vm1032_vm11, %v1243_v41 }
 0x485   :  { %v1240_v48 = vpop.permute.xlu2 %1239 }
 0x49d   :  { %v1233_v37 = vpop.permute.xlu1 %1232 }
 0x49e   :  { %v1226_v7 = vpop.permute.xlu0 %1225 }
 0x49f   :  { %1228 = vst.msk [vmem:[#allocation6 + $0x8] sm:$0xff] %vm941_vm8, %v1226_v7 }
 0x4a0   :  { %1235 = vst.msk [vmem:[#allocation6 + $0x8] sm:$0xff] %vm956_vm9, %v1233_v37 }
 0x4a1   :  { %1242 = vst.msk [vmem:[#allocation6 + $0x8] sm:$0xff] %vm971_vm10, %v1240_v48  ;;  %v1526_v48 = vld [vmem:[%s2679_s3 + $0x58] sm:$0xff] }
 0x4a2   :  { %1421 = vmatpush.msrb.mxu2 %v1526_v48 }
 0x4a8   :  { %v1244_v31 = vld [vmem:[#allocation6 + $0x8] sm:$0xff] }
 0x4a9   :  { %1521 = vmatmul.msk.f32.gmra.mxu1 %vm1032_vm11, %v1244_v31  ;;  %v1525_v31 = vld [vmem:[%s2679_s3 + $0x50] sm:$0xff] }
 0x4aa   :  { %1422 = vmatpush.msrb.mxu2 %v1525_v31 }
 0x4f4   :  { %v1275_v59 = vpop.f32.mrf.mxu1 }
 0x4f5   :  { %v1276_v30 = vadd.f32 %v1559_v38, %v1275_v59  ;;  %v1523_v59 = vld [vmem:[%s2679_s3 + $0x40] sm:$0xff] }
 0x4f7   :  { %v1285_v0 = vmul.f32 %v1284_v52, %v1276_v30  ;;  %vm1281_vm2 = vcmp.ge.f32.partialorder %v1276_v30, 0.0 }
 0x4f9   :  { %v1287_v1 = vsel %vm1281_vm2, %v1276_v30, %v1285_v0 }
 0x4fa   :  { %v1291_v62 = vsel %vm709_vm3, %v1287_v1, 0.0 }
 0x4fb   :  { %1292 = vadd.xlane.f32.xlu0 %v1291_v62  ;;  %v1562_v62 = vld [vmem:[%s2680_s4 + $0x3] ss:$0 sm:$0xff] }
 0x526   :  { %v1278_v2 = vpop.f32.mrf.mxu1 }
 0x527   :  { %v1279_v42 = vadd.f32 %v1559_v38, %v1278_v2  ;;  %v1524_v38 = vld [vmem:[%s2679_s3 + $0x48] sm:$0xff] }
 0x528   :  { %1423 = vmatpush.msrb.mxu2 %v1524_v38 }
 0x529   :  { %v1286_v11 = vmul.f32 %v1284_v52, %v1279_v42  ;;  %vm1282_vm8 = vcmp.ge.f32.partialorder %v1279_v42, 0.0 }
 0x52a   :  { %1424 = vmatpush.msrb.mxu2 %v1523_v59 }
 0x52b   :  { %v1288_v12 = vsel %vm1282_vm8, %v1279_v42, %v1286_v11  ;;  %v1431_v42 = vstv %s1528_s10  ;;  %vm1490_vm8 = vcmask 130048  }
 0x52c   :  { %v1294_v10 = vsel %vm709_vm3, %v1288_v12, 0.0 }
 0x52d   :  { %1295 = vadd.xlane.f32.xlu1 %v1294_v10 }
 0x56e   :  { %v1293_v8 = vpop.xlane.xlu0 %1292 }
 0x56f   :  { %v1297_v9 = vmul.f32 %v1293_v8, %v2366_v3 }
 0x571   :  { %v1299_v22 = vsub.f32 %v1287_v1, %v1297_v9 }
 0x573   :  { %v1301_v20 = vmul.f32 %v1299_v22, %v1299_v22 }
 0x575   :  { %v1303_v13 = vsel %vm709_vm3, %v1301_v20, 0.0 }
 0x576   :  { %1304 = vadd.xlane.f32.xlu2 %v1303_v13 }
 0x5a0   :  { %v1296_v14 = vpop.xlane.xlu1 %1295 }
 0x5a1   :  { %v1298_v18 = vmul.f32 %v1296_v14, %v2366_v3 }
 0x5a3   :  { %v1300_v47 = vsub.f32 %v1288_v12, %v1298_v18  ;;  %v1462_v18 = vld [vmem:[%s2683_s7] sm:$0xff] }
 0x5a4   :  { %1485 = vmatpush.msrb.mxu3 %v1462_v18 }
 0x5a5   :  { %v1302_v17 = vmul.f32 %v1300_v47, %v1300_v47 }
 0x5a7   :  { %v1306_v24 = vsel %vm709_vm3, %v1302_v17, 0.0 }
 0x5a8   :  { %1307 = vadd.xlane.f32.xlu0 %v1306_v24 }
 0x5e9   :  { %v1305_v61 = vpop.xlane.xlu2 %1304 }
 0x5ea   :  { %v1309_v16 = vmul.f32 %v1305_v61, %v2366_v3 }
 0x5ec   :  { %v1311_v28 = vadd.f32 1e-05, %v1309_v16 }
 0x5ee   :  { %1624 = vrsqrt.f32 %v1311_v28  ;;  %vm1319_vm10 = vweird.f32 %v1311_v28 }
 0x5f4   :  { %v1625_v51 = vpop.eup %1624 }
 0x5f5   :  { %v1314_v45 = vmul.f32 %v1625_v51, %v1311_v28  ;;  %vm1320_vm9 = vweird.f32 %v1625_v51 }
 0x5f6   :  { %vm1321_vm5 = vmor %vm1319_vm10, %vm1320_vm9 }
 0x5f7   :  { %v1315_v19 = vmul.f32 %v1625_v51, %v1314_v45 }
 0x5f9   :  { %v1316_v23 = vmul.f32 0.5, %v1315_v19 }
 0x5fb   :  { %v1317_v55 = vsub.f32 1.5, %v1316_v23  ;;  %v1563_v23 = vld [vmem:[%s2681_s5 + $0x3] ss:$0 sm:$0xff]  ;;  %s1499_s5 = sshll.u32 %s2685_s9, 4  ;;  %s1500_s5 = int_to_ptr.hbm [resolvable:$true] %s1499_s5 }
 0x5fd   :  { %v1318_v56 = vmul.f32 %v1625_v51, %v1317_v55 }
 0x5ff   :  { %v1322_v35 = vsel %vm1321_vm5, %v1625_v51, %v1318_v56 }
 0x600   :  { %v1333_v63 = vmul.f32 %v1322_v35, %v1299_v22 }
 0x602   :  { %v1336_v26 = vmul.f32 %v1560_v33, %v1333_v63 }
 0x604   :  { %v1339_v46 = vadd.f32 %v1561_v36, %v1336_v26 }
 0x606   :  { %1343 = vst.msk [vmem:[#allocation5 + $0x1] sm:$0xff] %vm709_vm3, %v1339_v46 }
 0x60d   :  { %v1359_v50 = vld [vmem:[#allocation5 + $0x2] ss:$2 sm:$0xf]  ;;  %v1351_v21 = vld [vmem:[#allocation5 + $0x1] ss:$2 sm:$0xf] }
 0x60e   :  { %1361 = vrot.lane.b32.xlu0 %v1359_v50, %s1675_s17  ;;  %1353 = vrot.lane.b32.xlu1 %v1351_v21, %s1676_s18  ;;  %v1347_v25 = vld [vmem:[#allocation5] ss:$2 sm:$0xf]  ;;  %v1367_v15 = vld [vmem:[#allocation5 + $0x3] ss:$2 sm:$0xf] }
 0x60f   :  { %1349 = vst.msk [vmem:[#allocation6] sm:$0xf] %vm1348_vm13, %v1347_v25 }
 0x616   :  { %1369 = vrot.lane.b32.xlu0 %v1367_v15, %s1674_s16 }
 0x61b   :  { %v1308_v53 = vpop.xlane.xlu0 %1307 }
 0x61c   :  { %v1310_v43 = vmul.f32 %v1308_v53, %v2366_v3 }
 0x61e   :  { %v1312_v39 = vadd.f32 1e-05, %v1310_v43 }
 0x620   :  { %1626 = vrsqrt.f32 %v1312_v39  ;;  %vm1329_vm6 = vweird.f32 %v1312_v39 }
 0x626   :  { %v1627_v6 = vpop.eup %1626 }
 0x627   :  { %v1324_v60 = vmul.f32 %v1627_v6, %v1312_v39  ;;  %vm1330_vm4 = vweird.f32 %v1627_v6 }
 0x628   :  { %vm1331_vm7 = vmor %vm1329_vm6, %vm1330_vm4 }
 0x629   :  { %v1325_v27 = vmul.f32 %v1627_v6, %v1324_v60 }
 0x62b   :  { %v1326_v54 = vmul.f32 0.5, %v1325_v27 }
 0x62d   :  { %v1327_v49 = vsub.f32 1.5, %v1326_v54 }
 0x62f   :  { %v1328_v29 = vmul.f32 %v1627_v6, %v1327_v49 }
 0x631   :  { %v1332_v44 = vsel %vm1331_vm7, %v1627_v6, %v1328_v29 }
 0x632   :  { %v1334_v4 = vmul.f32 %v1332_v44, %v1300_v47 }
 0x634   :  { %v1337_v40 = vmul.f32 %v1560_v33, %v1334_v4 }
 0x636   :  { %v1340_v32 = vadd.f32 %v1561_v36, %v1337_v40  ;;  %v1565_v36 = vld [vmem:[%s2684_s8] ss:$0 sm:$0xff] }
 0x638   :  { %1346 = vst.msk [vmem:[#allocation5 + $0xb] sm:$0xff] %vm709_vm3, %v1340_v32 }
 0x63f   :  { %v1385_v34 = vld [vmem:[#allocation5 + $0xc] ss:$2 sm:$0xf]  ;;  %v1378_v57 = vld [vmem:[#allocation5 + $0xb] ss:$2 sm:$0xf] }
 0x640   :  { %1387 = vrot.lane.b32.xlu1 %v1385_v34, %s1675_s17  ;;  %1380 = vrot.lane.b32.xlu2 %v1378_v57, %s1676_s18  ;;  %v1375_v5 = vld [vmem:[#allocation5 + $0xa] ss:$2 sm:$0xf]  ;;  %v1392_v58 = vld [vmem:[#allocation5 + $0xd] ss:$2 sm:$0xf] }
 0x641   :  { %1376 = vst.msk [vmem:[#allocation6 + $0x4] sm:$0xf] %vm1348_vm13, %v1375_v5 }
 0x648   :  { %1394 = vrot.lane.b32.xlu2 %v1392_v58, %s1674_s16 }
 0x680   :  { %v1354_v41 = vpop.permute.xlu1 %1353  ;;  %v1362_v37 = vpop.permute.xlu0 %1361 }
 0x681   :  { %1357 = vst.msk [vmem:[#allocation6] sm:$0xf] %vm1356_vm12, %v1354_v41 }
 0x682   :  { %1365 = vst.msk [vmem:[#allocation6] sm:$0xf] %vm1364_vm14, %v1362_v37 }
 0x688   :  { %v1370_v7 = vpop.permute.xlu0 %1369 }
 0x689   :  { %1373 = vst.msk [vmem:[#allocation6] sm:$0xf] %vm1372_vm15, %v1370_v7 }
 0x69a   :  { %v1381_v52 = vpop.permute.xlu2 %1380 }
 0x69b   :  { %1383 = vst.msk [vmem:[#allocation6 + $0x4] sm:$0xf] %vm1356_vm12, %v1381_v52 }
 0x6a2   :  { %v1395_v0 = vpop.permute.xlu2 %1394 }
 0x6b2   :  { %v1388_v30 = vpop.permute.xlu1 %1387 }
 0x6b3   :  { %1390 = vst.msk [vmem:[#allocation6 + $0x4] sm:$0xf] %vm1364_vm14, %v1388_v30 }
 0x6b4   :  { %1397 = vst.msk [vmem:[#allocation6 + $0x4] sm:$0xf] %vm1372_vm15, %v1395_v0 }
 0x6bb   :  { %v1398_v1 = vld [vmem:[#allocation6] sm:$0xff] }
 0x6bc   :  { %1527 = vmatmul.msk.f32.vlgmr.msrb.gmra.mxu2 %vm1032_vm11, %v1398_v1 }
 0x73f   :  { %v1426_v2 = vpop.f32.mrf.mxu2 }
 0x740   :  { %v1427_v11 = vadd.f32 %v1562_v62, %v1426_v2 }
 0x742   :  { %v1432_v12 = vmul.f32 %v1431_v42, %v1427_v11  ;;  %vm1429_vm0 = vcmp.ge.f32.partialorder %v1427_v11, 0.0 }
 0x744   :  { %v1433_v10 = vsel %vm1429_vm0, %v1427_v11, %v1432_v12 }
 0x745   :  { %v1436_v8 = vsel %vm709_vm3, %v1433_v10, 0.0 }
 0x746   :  { %1437 = vadd.xlane.f32.xlu1 %v1436_v8 }
 0x7b9   :  { %v1438_v9 = vpop.xlane.xlu1 %1437 }
 0x7ba   :  { %v1439_v22 = vmul.f32 %v1438_v9, %v2366_v3 }
 0x7bc   :  { %v1440_v20 = vsub.f32 %v1433_v10, %v1439_v22 }
 0x7be   :  { %v1441_v13 = vmul.f32 %v1440_v20, %v1440_v20 }
 0x7c0   :  { %v1442_v14 = vsel %vm709_vm3, %v1441_v13, 0.0 }
 0x7c1   :  { %1443 = vadd.xlane.f32.xlu0 %v1442_v14 }
 0x834   :  { %v1444_v47 = vpop.xlane.xlu0 %1443 }
 0x835   :  { %v1445_v17 = vmul.f32 %v1444_v47, %v2366_v3  ;;  %v1564_v3 = vld [vmem:[%s2682_s6 + $0x3] ss:$0 sm:$0xff] }
 0x837   :  { %v1446_v24 = vadd.f32 1e-05, %v1445_v17 }
 0x839   :  { %1628 = vrsqrt.f32 %v1446_v24  ;;  %vm1453_vm1 = vweird.f32 %v1446_v24 }
 0x83f   :  { %v1629_v61 = vpop.eup %1628 }
 0x840   :  { %v1448_v16 = vmul.f32 %v1629_v61, %v1446_v24  ;;  %vm1454_vm11 = vweird.f32 %v1629_v61 }
 0x841   :  { %vm1455_vm2 = vmor %vm1453_vm1, %vm1454_vm11 }
 0x842   :  { %v1449_v28 = vmul.f32 %v1629_v61, %v1448_v16 }
 0x844   :  { %v1450_v51 = vmul.f32 0.5, %v1449_v28 }
 0x846   :  { %v1451_v45 = vsub.f32 1.5, %v1450_v51 }
 0x848   :  { %v1452_v19 = vmul.f32 %v1629_v61, %v1451_v45 }
 0x84a   :  { %v1456_v55 = vsel %vm1455_vm2, %v1629_v61, %v1452_v19 }
 0x84b   :  { %v1457_v56 = vmul.f32 %v1456_v55, %v1440_v20 }
 0x84d   :  { %v1459_v33 = vmul.f32 %v1563_v23, %v1457_v56 }
 0x84f   :  { %v1461_v35 = vadd.f32 %v1564_v3, %v1459_v33 }
 0x851   :  { %1529 = vmatmul.msk.f32.vlgmr.msrb.gmra.mxu3 %vm709_vm3, %v1461_v35 }
 0x8d4   :  { %v1487_v63 = vpop.f32.mrf.mxu3 }
 0x8d5   :  { %v1488_v26 = vadd.f32 %v1565_v36, %v1487_v63 }
 0x8d7   :  { %1491 = vst.msk [vmem:[#allocation10] sm:$0xff] %vm1490_vm8, %v1488_v26 }
 0x8d8   :  { %1502 = dma.vmem_to_hbm [thread:$0]  %s1498_s20, 128, %s1500_s5, [#allocation8]  }
 0x8d9   :  { %1668 = dma.done.wait [#allocation8], 128  }
 0x8da   :  { %1669 = vsyncadd [#allocation8], 4294967168 }
 0x8db   :  { %1507 = vsyncpa [#allocation8], 1 }
 0x8dc   :  { %1508 = vsyncpa [#allocation9], 1 }

</bundles_post_ra>
